<compile_context>
chip_gen: v6e
topology: v6e:2x2x1
jax: 0.10.0
libtpu: 0.0.40
codegen_flags: <defaults>
</compile_context>

<pallas_src>
import functools

import jax
import jax.numpy as jnp
from jax.experimental import pallas as pl
from jax.experimental.pallas import tpu as pltpu

EPS = 1e-5
K_IN = 784           # 28 * 28
HIDDEN = 512


# ----------------------------- in-kernel helpers -----------------------------
def _batchnorm(x, gamma, beta):
  """BatchNorm1d, training-mode batch statistics (biased variance), eps=1e-5."""
  mu = jnp.mean(x, axis=0, keepdims=True)
  var = jnp.mean((x - mu) ** 2, axis=0, keepdims=True)
  return (x - mu) * jax.lax.rsqrt(var + EPS) * gamma + beta


def _binary_act(x):
  """add_act(abits=1): deterministic sign activation, sign(0) -> +1."""
  return jnp.where(x >= 0.0, 1.0, -1.0).astype(x.dtype)


# --------------------------------- kernel ------------------------------------
def lsq_mlp_kernel(x_ref, w1_ref, w2_hbm, w3_hbm, w4_hbm, bn_ref, o_ref,
                   w2_buf, w3_buf, w4_buf, sem,
                   *, abits, q_dtype, acc_dtype, n4):
  """Fused fc1->bn1->act->fc2->bn2->act->fc3->bn3->fc4->bn4.

  x_ref : (B, 784)       f32   (flattened input, cast to bf16 in-kernel)
  w1_ref: (784, 512)     bf16  (auto-DMA'd to VMEM)
  wN_hbm: HBM refs for fc2/fc3/fc4 weights (manually streamed)
  bn_ref: (8, 512)       f32   rows = [g1,be1,g2,be2,g3,be3,g4,be4]
  o_ref : (B, n4)        f32
  """
  # Start streaming the fc2/fc3/fc4 weights (the bulk of remaining HBM bytes)
  # while the fc1 chain computes; wait only right before each dot needs them.
  cp2 = pltpu.make_async_copy(w2_hbm, w2_buf, sem.at[0]); cp2.start()
  cp3 = pltpu.make_async_copy(w3_hbm, w3_buf, sem.at[1]); cp3.start()
  cp4 = pltpu.make_async_copy(w4_hbm, w4_buf, sem.at[2]); cp4.start()

  bn = bn_ref[...]
  x = x_ref[...].astype(jnp.bfloat16)

  # fc1 (wbits=32, bf16 matmul / f32 acc; bias cancelled by bn1) -> bn1 -> qact
  h = jnp.dot(x, w1_ref[...], preferred_element_type=jnp.float32)
  h = _batchnorm(h, bn[0:1, :], bn[1:2, :])
  if abits == 1:
    h = _binary_act(h)
  hq = h.astype(q_dtype)            # ±1 is exact in int8 / fp8 / bf16

  # fc2 (pre-binarized 8-bit weights) -> bn2 -> qact
  cp2.wait()
  h = jnp.dot(hq, w2_buf[...],
              preferred_element_type=acc_dtype).astype(jnp.float32)
  h = _batchnorm(h, bn[2:3, :], bn[3:4, :])
  if abits == 1:
    h = _binary_act(h)
  hq = h.astype(q_dtype)

  # fc3 (pre-binarized 8-bit weights) -> bn3 -> act (abits=32 => identity)
  cp3.wait()
  h = jnp.dot(hq, w3_buf[...],
              preferred_element_type=acc_dtype).astype(jnp.float32)
  h = _batchnorm(h, bn[4:5, :], bn[5:6, :])
  h = h.astype(jnp.bfloat16)

  # fc4 (wbits=32, bias cancelled by bn4) -> bn4
  cp4.wait()
  h = jnp.dot(h, w4_buf[...], preferred_element_type=jnp.float32)
  o_ref[...] = _batchnorm(h, bn[6:7, :n4], bn[7:8, :n4])


# ----------------------- one-time parameter preparation ----------------------
def select_q_dtype(wbits, abits):
  """8-bit operand dtype for the binarized fc2/fc3 matmuls, per TPU generation."""
  if wbits != 1 or abits != 1:
    return jnp.bfloat16            # continuous operands -> stay bf16
  kind = jax.devices()[0].device_kind.lower()
  if ("v7" in kind) or ("7x" in kind):
    return jnp.float8_e4m3fn       # v7x MXU is fp8-only (no integer path)
  if any(g in kind for g in ("v4", "v5", "v6")):
    return jnp.int8                # native i8 MXU
  return jnp.bfloat16              # unknown backend: safe fallback
  # TODO(synk): int4 w2/w3 on v5e/v6e would cut another ~37% of their bytes.


def prepare_params(params, *, wbits=1, abits=1):
  """Hoists all weight quantization / padding / coalescing out of the kernel."""
  nc = params["w4"].shape[1]
  nc_pad = max(128, ((nc + 127) // 128) * 128)
  q_dtype = select_q_dtype(wbits, abits)

  def quant(w):
    if wbits == 1:
      # TODO(synk): LSQ uses a learned step size; approximated as sign
      # binarization.  The per-column magnitude scale (and the bias) are
      # exactly cancelled by the following batch-statistics BatchNorm.
      return jnp.where(w >= 0.0, 1.0, -1.0).astype(q_dtype)
    return w.astype(jnp.bfloat16)

  w1p = params["w1"].astype(jnp.bfloat16)                 # (784, 512), no K pad
  w2q = quant(params["w2"])                               # (512, 512) 8-bit
  w3q = quant(params["w3"])                               # (512, 512) 8-bit
  # fc4: pad num_classes -> 128 with zero columns (lane-dense output stores).
  w4p = jnp.pad(params["w4"], ((0, 0), (0, nc_pad - nc))).astype(jnp.bfloat16)

  # Coalesce all BN gammas/betas into a single (8, HIDDEN) f32 array.  Linear
  # biases b1..b4 are not included: training-mode BN mean subtraction removes
  # them exactly.
  bn = jnp.zeros((8, HIDDEN), jnp.float32)
  bn = bn.at[0, :].set(params["g1"].reshape(-1))
  bn = bn.at[1, :].set(params["be1"].reshape(-1))
  bn = bn.at[2, :].set(params["g2"].reshape(-1))
  bn = bn.at[3, :].set(params["be2"].reshape(-1))
  bn = bn.at[4, :].set(params["g3"].reshape(-1))
  bn = bn.at[5, :].set(params["be3"].reshape(-1))
  bn = bn.at[6, :nc].set(params["g4"].reshape(-1))
  bn = bn.at[7, :nc].set(params["be4"].reshape(-1))

  return {"w1": w1p, "w2": w2q, "w3": w3q, "w4": w4p, "bn": bn,
          "num_classes": nc, "q_dtype": q_dtype, "wbits": wbits, "abits": abits}


# -------------------------------- wrapper ------------------------------------
def lsq_mlp_forward(x, prep, *, abits=1):
  """x: [B, C, H, W] with C*H*W == 784. Returns logits [B, num_classes]."""
  assert abits == prep["abits"], "prep was built for a different abits"
  B = x.shape[0]
  x2 = x.reshape(B, -1)                       # torch.flatten(x, 1), stays f32
  assert x2.shape[1] == K_IN, "LSQ_mlp expects 784 input features"

  nc = prep["num_classes"]
  nc_pad = prep["w4"].shape[1]
  q_dtype = prep["q_dtype"]
  acc_dtype = (jnp.int32 if jnp.dtype(q_dtype) == jnp.dtype(jnp.int8)
               else jnp.float32)

  kernel = functools.partial(lsq_mlp_kernel, abits=abits, q_dtype=q_dtype,
                             acc_dtype=acc_dtype, n4=nc_pad)

  vmem = pl.BlockSpec(memory_space=pltpu.MemorySpace.VMEM)
  anyspec = pl.BlockSpec(memory_space=pl.ANY)

  # TODO(synk): no batch grid — batch-statistics BN couples all rows, so a
  # batch grid would need a two-pass reduction (or running stats) first.
  out = pl.pallas_call(
      kernel,
      out_shape=jax.ShapeDtypeStruct((B, nc_pad), jnp.float32),
      in_specs=[vmem, vmem, anyspec, anyspec, anyspec, vmem],
      out_specs=vmem,
      scratch_shapes=[
          pltpu.VMEM((HIDDEN, HIDDEN), q_dtype),       # w2 landing buffer
          pltpu.VMEM((HIDDEN, HIDDEN), q_dtype),       # w3 landing buffer
          pltpu.VMEM((HIDDEN, nc_pad), jnp.bfloat16),  # w4 landing buffer
          pltpu.SemaphoreType.DMA((3,)),
      ],
      compiler_params=pltpu.CompilerParams(vmem_limit_bytes=16 * 1024 * 1024),
  )(x2, prep["w1"], prep["w2"], prep["w3"], prep["w4"], prep["bn"])

  # TODO(synk): for serving with static weights, keep w1..w4/bn resident in
  # VMEM across calls (pl.get_global + first-call load) to drop per-call DMA.
  return out[:B, :nc]


# ------------------------------ param init -----------------------------------
def init_params(key, num_classes=10):
  """Deterministic synthetic parameters (nn.Linear-style uniform init)."""
  dims = [(K_IN, HIDDEN), (HIDDEN, HIDDEN), (HIDDEN, HIDDEN),
          (HIDDEN, num_classes)]
  params = {}
  keys = jax.random.split(key, 4 * 4)
  for i, (fan_in, fan_out) in enumerate(dims, start=1):
    kw, kb, kg, kbe = keys[(i - 1) * 4:(i - 1) * 4 + 4]
    bound = 1.0 / jnp.sqrt(float(fan_in))
    # weights stored [in, out] (pre-transposed from PyTorch's [out, in])
    params[f"w{i}"] = jax.random.uniform(
        kw, (fan_in, fan_out), jnp.float32, -bound, bound)
    # biases are generated for interface fidelity but are cancelled by the
    # following batch-statistics BatchNorm and never reach the kernel.
    params[f"b{i}"] = jax.random.uniform(
        kb, (1, fan_out), jnp.float32, -bound, bound)
    params[f"g{i}"] = jax.random.uniform(
        kg, (1, fan_out), jnp.float32, 0.5, 1.5)       # BN gamma
    params[f"be{i}"] = 0.1 * jax.random.normal(
        kbe, (1, fan_out), jnp.float32)                # BN beta
  return params


# --------------------------------- main --------------------------------------
if __name__ == "__main__":
  key = jax.random.PRNGKey(0)
  k_x, k_p = jax.random.split(key)

  # Small input consistent with the module: NCHW [2, 1, 28, 28] -> 784 features.
  x = jax.random.normal(k_x, (2, 1, 28, 28), jnp.float32)
  params = init_params(k_p, num_classes=10)

  # One-time parameter prep (weight binarization / 8-bit packing hoisted out).
  prep = prepare_params(params, wbits=1, abits=1)

  out = lsq_mlp_forward(x, prep, abits=1)
  out = jax.block_until_ready(out)

  assert out.shape == (2, 10) and out.dtype == jnp.float32
  assert bool(jnp.all(jnp.isfinite(out)))
  print("KERNEL_OK")
</pallas_src>

<mosaic_0001>
module attributes {stable_mosaic.version = 11 : i64} {
  func.func @lsq_mlp_kernel(%arg0: memref<2x784xf32, #tpu.memory_space<vmem>>, %arg1: memref<784x512xbf16, #tpu.memory_space<vmem>>, %arg2: memref<512x512xbf16, #tpu.memory_space<any>>, %arg3: memref<512x512xbf16, #tpu.memory_space<any>>, %arg4: memref<512x128xbf16, #tpu.memory_space<any>>, %arg5: memref<8x512xf32, #tpu.memory_space<vmem>>, %arg6: memref<2x128xf32, #tpu.memory_space<vmem>>, %arg7: memref<512x512xbf16, #tpu.memory_space<vmem>>, %arg8: memref<512x512xbf16, #tpu.memory_space<vmem>>, %arg9: memref<512x128xbf16, #tpu.memory_space<vmem>>, %arg10: memref<3x!tpu.dma_semaphore, #tpu.memory_space<semaphore_mem>>) attributes {dimension_semantics = [], scalar_prefetch = 0 : i64, scratch_operands = 4 : i64, tpu.core_type = #tpu.core_type<tc>} {
    %c0_i32 = arith.constant 0 : i32
    %0 = tpu.memref_slice %arg10[%c0_i32] : memref<3x!tpu.dma_semaphore, #tpu.memory_space<semaphore_mem>> -> memref<1x!tpu.dma_semaphore, #tpu.memory_space<semaphore_mem>>
    %1 = tpu.memref_squeeze %0 : memref<1x!tpu.dma_semaphore, #tpu.memory_space<semaphore_mem>> -> memref<!tpu.dma_semaphore, #tpu.memory_space<semaphore_mem>>
    tpu.enqueue_dma source(%arg2 : memref<512x512xbf16, #tpu.memory_space<any>>) target(%arg7 : memref<512x512xbf16, #tpu.memory_space<vmem>>) target_semaphore(%1 : memref<!tpu.dma_semaphore, #tpu.memory_space<semaphore_mem>>)
    %c1_i32 = arith.constant 1 : i32
    %2 = tpu.memref_slice %arg10[%c1_i32] : memref<3x!tpu.dma_semaphore, #tpu.memory_space<semaphore_mem>> -> memref<1x!tpu.dma_semaphore, #tpu.memory_space<semaphore_mem>>
    %3 = tpu.memref_squeeze %2 : memref<1x!tpu.dma_semaphore, #tpu.memory_space<semaphore_mem>> -> memref<!tpu.dma_semaphore, #tpu.memory_space<semaphore_mem>>
    tpu.enqueue_dma source(%arg3 : memref<512x512xbf16, #tpu.memory_space<any>>) target(%arg8 : memref<512x512xbf16, #tpu.memory_space<vmem>>) target_semaphore(%3 : memref<!tpu.dma_semaphore, #tpu.memory_space<semaphore_mem>>)
    %c2_i32 = arith.constant 2 : i32
    %4 = tpu.memref_slice %arg10[%c2_i32] : memref<3x!tpu.dma_semaphore, #tpu.memory_space<semaphore_mem>> -> memref<1x!tpu.dma_semaphore, #tpu.memory_space<semaphore_mem>>
    %5 = tpu.memref_squeeze %4 : memref<1x!tpu.dma_semaphore, #tpu.memory_space<semaphore_mem>> -> memref<!tpu.dma_semaphore, #tpu.memory_space<semaphore_mem>>
    tpu.enqueue_dma source(%arg4 : memref<512x128xbf16, #tpu.memory_space<any>>) target(%arg9 : memref<512x128xbf16, #tpu.memory_space<vmem>>) target_semaphore(%5 : memref<!tpu.dma_semaphore, #tpu.memory_space<semaphore_mem>>)
    %c0 = arith.constant 0 : index
    %c0_0 = arith.constant 0 : index
    %6 = vector.load %arg5[%c0, %c0_0] : memref<8x512xf32, #tpu.memory_space<vmem>>, vector<8x512xf32>
    %c0_1 = arith.constant 0 : index
    %c0_2 = arith.constant 0 : index
    %7 = vector.load %arg0[%c0_1, %c0_2] : memref<2x784xf32, #tpu.memory_space<vmem>>, vector<2x784xf32>
    %8 = arith.truncf %7 : vector<2x784xf32> to vector<2x784xbf16>
    %c0_3 = arith.constant 0 : index
    %c0_4 = arith.constant 0 : index
    %9 = vector.load %arg1[%c0_3, %c0_4] : memref<784x512xbf16, #tpu.memory_space<vmem>>, vector<784x512xbf16>
    %cst = arith.constant dense<0.000000e+00> : vector<2x512xf32>
    %10 = tpu.matmul %8, %9, %cst {dimension_numbers = #tpu.dot_dimension_numbers<[1], [0], [0], [1], [0, 0, 1, 1], [], []>} : vector<2x784xbf16>, vector<784x512xbf16>, vector<2x512xf32> -> vector<2x512xf32>
    %11 = vector.extract_strided_slice %6 {offsets = [0, 0], sizes = [1, 512], strides = [1, 1]} : vector<8x512xf32> to vector<1x512xf32>
    %12 = vector.extract_strided_slice %6 {offsets = [1, 0], sizes = [1, 512], strides = [1, 1]} : vector<8x512xf32> to vector<1x512xf32>
    %cst_5 = arith.constant dense<0.000000e+00> : vector<512xf32>
    %13 = vector.multi_reduction <add>, %10, %cst_5 [0] : vector<2x512xf32> to vector<512xf32>
    %14 = vector.shape_cast %13 : vector<512xf32> to vector<1x512xf32>
    %cst_6 = arith.constant 2.000000e+00 : f32
    %15 = vector.broadcast %cst_6 : f32 to vector<1x512xf32>
    %16 = arith.divf %14, %15 : vector<1x512xf32>
    %17 = vector.broadcast %16 : vector<1x512xf32> to vector<2x512xf32>
    %18 = arith.subf %10, %17 : vector<2x512xf32>
    %19 = arith.mulf %18, %18 : vector<2x512xf32>
    %cst_7 = arith.constant dense<0.000000e+00> : vector<512xf32>
    %20 = vector.multi_reduction <add>, %19, %cst_7 [0] : vector<2x512xf32> to vector<512xf32>
    %21 = vector.shape_cast %20 : vector<512xf32> to vector<1x512xf32>
    %cst_8 = arith.constant 2.000000e+00 : f32
    %22 = vector.broadcast %cst_8 : f32 to vector<1x512xf32>
    %23 = arith.divf %21, %22 : vector<1x512xf32>
    %24 = vector.broadcast %16 : vector<1x512xf32> to vector<2x512xf32>
    %25 = arith.subf %10, %24 : vector<2x512xf32>
    %cst_9 = arith.constant 9.99999974E-6 : f32
    %26 = vector.broadcast %cst_9 : f32 to vector<1x512xf32>
    %27 = arith.addf %23, %26 : vector<1x512xf32>
    %28 = math.rsqrt %27 : vector<1x512xf32>
    %29 = vector.broadcast %28 : vector<1x512xf32> to vector<2x512xf32>
    %30 = arith.mulf %25, %29 : vector<2x512xf32>
    %31 = vector.broadcast %11 : vector<1x512xf32> to vector<2x512xf32>
    %32 = arith.mulf %30, %31 : vector<2x512xf32>
    %33 = vector.broadcast %12 : vector<1x512xf32> to vector<2x512xf32>
    %34 = arith.addf %32, %33 : vector<2x512xf32>
    %cst_10 = arith.constant 0.000000e+00 : f32
    %35 = vector.broadcast %cst_10 : f32 to vector<2x512xf32>
    %36 = arith.cmpf oge, %34, %35 : vector<2x512xf32>
    %cst_11 = arith.constant 1.000000e+00 : f32
    %cst_12 = arith.constant -1.000000e+00 : f32
    %37 = vector.broadcast %cst_11 : f32 to vector<2x512xf32>
    %38 = vector.broadcast %cst_12 : f32 to vector<2x512xf32>
    %39 = arith.select %36, %37, %38 : vector<2x512xi1>, vector<2x512xf32>
    %40 = arith.truncf %39 : vector<2x512xf32> to vector<2x512xbf16>
    %c0_i32_13 = arith.constant 0 : i32
    %41 = tpu.memref_slice %arg10[%c0_i32_13] : memref<3x!tpu.dma_semaphore, #tpu.memory_space<semaphore_mem>> -> memref<1x!tpu.dma_semaphore, #tpu.memory_space<semaphore_mem>>
    %42 = tpu.memref_squeeze %41 : memref<1x!tpu.dma_semaphore, #tpu.memory_space<semaphore_mem>> -> memref<!tpu.dma_semaphore, #tpu.memory_space<semaphore_mem>>
    tpu.wait_dma2 semaphore(%42 : memref<!tpu.dma_semaphore, #tpu.memory_space<semaphore_mem>>) src(%arg2 : memref<512x512xbf16, #tpu.memory_space<any>>) dst(%arg7 : memref<512x512xbf16, #tpu.memory_space<vmem>>)
    %c0_14 = arith.constant 0 : index
    %c0_15 = arith.constant 0 : index
    %43 = vector.load %arg7[%c0_14, %c0_15] : memref<512x512xbf16, #tpu.memory_space<vmem>>, vector<512x512xbf16>
    %cst_16 = arith.constant dense<0.000000e+00> : vector<2x512xf32>
    %44 = tpu.matmul %40, %43, %cst_16 {dimension_numbers = #tpu.dot_dimension_numbers<[1], [0], [0], [1], [0, 0, 1, 1], [], []>} : vector<2x512xbf16>, vector<512x512xbf16>, vector<2x512xf32> -> vector<2x512xf32>
    %45 = vector.extract_strided_slice %6 {offsets = [2, 0], sizes = [1, 512], strides = [1, 1]} : vector<8x512xf32> to vector<1x512xf32>
    %46 = vector.extract_strided_slice %6 {offsets = [3, 0], sizes = [1, 512], strides = [1, 1]} : vector<8x512xf32> to vector<1x512xf32>
    %cst_17 = arith.constant dense<0.000000e+00> : vector<512xf32>
    %47 = vector.multi_reduction <add>, %44, %cst_17 [0] : vector<2x512xf32> to vector<512xf32>
    %48 = vector.shape_cast %47 : vector<512xf32> to vector<1x512xf32>
    %cst_18 = arith.constant 2.000000e+00 : f32
    %49 = vector.broadcast %cst_18 : f32 to vector<1x512xf32>
    %50 = arith.divf %48, %49 : vector<1x512xf32>
    %51 = vector.broadcast %50 : vector<1x512xf32> to vector<2x512xf32>
    %52 = arith.subf %44, %51 : vector<2x512xf32>
    %53 = arith.mulf %52, %52 : vector<2x512xf32>
    %cst_19 = arith.constant dense<0.000000e+00> : vector<512xf32>
    %54 = vector.multi_reduction <add>, %53, %cst_19 [0] : vector<2x512xf32> to vector<512xf32>
    %55 = vector.shape_cast %54 : vector<512xf32> to vector<1x512xf32>
    %cst_20 = arith.constant 2.000000e+00 : f32
    %56 = vector.broadcast %cst_20 : f32 to vector<1x512xf32>
    %57 = arith.divf %55, %56 : vector<1x512xf32>
    %58 = vector.broadcast %50 : vector<1x512xf32> to vector<2x512xf32>
    %59 = arith.subf %44, %58 : vector<2x512xf32>
    %cst_21 = arith.constant 9.99999974E-6 : f32
    %60 = vector.broadcast %cst_21 : f32 to vector<1x512xf32>
    %61 = arith.addf %57, %60 : vector<1x512xf32>
    %62 = math.rsqrt %61 : vector<1x512xf32>
    %63 = vector.broadcast %62 : vector<1x512xf32> to vector<2x512xf32>
    %64 = arith.mulf %59, %63 : vector<2x512xf32>
    %65 = vector.broadcast %45 : vector<1x512xf32> to vector<2x512xf32>
    %66 = arith.mulf %64, %65 : vector<2x512xf32>
    %67 = vector.broadcast %46 : vector<1x512xf32> to vector<2x512xf32>
    %68 = arith.addf %66, %67 : vector<2x512xf32>
    %cst_22 = arith.constant 0.000000e+00 : f32
    %69 = vector.broadcast %cst_22 : f32 to vector<2x512xf32>
    %70 = arith.cmpf oge, %68, %69 : vector<2x512xf32>
    %cst_23 = arith.constant 1.000000e+00 : f32
    %cst_24 = arith.constant -1.000000e+00 : f32
    %71 = vector.broadcast %cst_23 : f32 to vector<2x512xf32>
    %72 = vector.broadcast %cst_24 : f32 to vector<2x512xf32>
    %73 = arith.select %70, %71, %72 : vector<2x512xi1>, vector<2x512xf32>
    %74 = arith.truncf %73 : vector<2x512xf32> to vector<2x512xbf16>
    %c1_i32_25 = arith.constant 1 : i32
    %75 = tpu.memref_slice %arg10[%c1_i32_25] : memref<3x!tpu.dma_semaphore, #tpu.memory_space<semaphore_mem>> -> memref<1x!tpu.dma_semaphore, #tpu.memory_space<semaphore_mem>>
    %76 = tpu.memref_squeeze %75 : memref<1x!tpu.dma_semaphore, #tpu.memory_space<semaphore_mem>> -> memref<!tpu.dma_semaphore, #tpu.memory_space<semaphore_mem>>
    tpu.wait_dma2 semaphore(%76 : memref<!tpu.dma_semaphore, #tpu.memory_space<semaphore_mem>>) src(%arg3 : memref<512x512xbf16, #tpu.memory_space<any>>) dst(%arg8 : memref<512x512xbf16, #tpu.memory_space<vmem>>)
    %c0_26 = arith.constant 0 : index
    %c0_27 = arith.constant 0 : index
    %77 = vector.load %arg8[%c0_26, %c0_27] : memref<512x512xbf16, #tpu.memory_space<vmem>>, vector<512x512xbf16>
    %cst_28 = arith.constant dense<0.000000e+00> : vector<2x512xf32>
    %78 = tpu.matmul %74, %77, %cst_28 {dimension_numbers = #tpu.dot_dimension_numbers<[1], [0], [0], [1], [0, 0, 1, 1], [], []>} : vector<2x512xbf16>, vector<512x512xbf16>, vector<2x512xf32> -> vector<2x512xf32>
    %79 = vector.extract_strided_slice %6 {offsets = [4, 0], sizes = [1, 512], strides = [1, 1]} : vector<8x512xf32> to vector<1x512xf32>
    %80 = vector.extract_strided_slice %6 {offsets = [5, 0], sizes = [1, 512], strides = [1, 1]} : vector<8x512xf32> to vector<1x512xf32>
    %cst_29 = arith.constant dense<0.000000e+00> : vector<512xf32>
    %81 = vector.multi_reduction <add>, %78, %cst_29 [0] : vector<2x512xf32> to vector<512xf32>
    %82 = vector.shape_cast %81 : vector<512xf32> to vector<1x512xf32>
    %cst_30 = arith.constant 2.000000e+00 : f32
    %83 = vector.broadcast %cst_30 : f32 to vector<1x512xf32>
    %84 = arith.divf %82, %83 : vector<1x512xf32>
    %85 = vector.broadcast %84 : vector<1x512xf32> to vector<2x512xf32>
    %86 = arith.subf %78, %85 : vector<2x512xf32>
    %87 = arith.mulf %86, %86 : vector<2x512xf32>
    %cst_31 = arith.constant dense<0.000000e+00> : vector<512xf32>
    %88 = vector.multi_reduction <add>, %87, %cst_31 [0] : vector<2x512xf32> to vector<512xf32>
    %89 = vector.shape_cast %88 : vector<512xf32> to vector<1x512xf32>
    %cst_32 = arith.constant 2.000000e+00 : f32
    %90 = vector.broadcast %cst_32 : f32 to vector<1x512xf32>
    %91 = arith.divf %89, %90 : vector<1x512xf32>
    %92 = vector.broadcast %84 : vector<1x512xf32> to vector<2x512xf32>
    %93 = arith.subf %78, %92 : vector<2x512xf32>
    %cst_33 = arith.constant 9.99999974E-6 : f32
    %94 = vector.broadcast %cst_33 : f32 to vector<1x512xf32>
    %95 = arith.addf %91, %94 : vector<1x512xf32>
    %96 = math.rsqrt %95 : vector<1x512xf32>
    %97 = vector.broadcast %96 : vector<1x512xf32> to vector<2x512xf32>
    %98 = arith.mulf %93, %97 : vector<2x512xf32>
    %99 = vector.broadcast %79 : vector<1x512xf32> to vector<2x512xf32>
    %100 = arith.mulf %98, %99 : vector<2x512xf32>
    %101 = vector.broadcast %80 : vector<1x512xf32> to vector<2x512xf32>
    %102 = arith.addf %100, %101 : vector<2x512xf32>
    %103 = arith.truncf %102 : vector<2x512xf32> to vector<2x512xbf16>
    %c2_i32_34 = arith.constant 2 : i32
    %104 = tpu.memref_slice %arg10[%c2_i32_34] : memref<3x!tpu.dma_semaphore, #tpu.memory_space<semaphore_mem>> -> memref<1x!tpu.dma_semaphore, #tpu.memory_space<semaphore_mem>>
    %105 = tpu.memref_squeeze %104 : memref<1x!tpu.dma_semaphore, #tpu.memory_space<semaphore_mem>> -> memref<!tpu.dma_semaphore, #tpu.memory_space<semaphore_mem>>
    tpu.wait_dma2 semaphore(%105 : memref<!tpu.dma_semaphore, #tpu.memory_space<semaphore_mem>>) src(%arg4 : memref<512x128xbf16, #tpu.memory_space<any>>) dst(%arg9 : memref<512x128xbf16, #tpu.memory_space<vmem>>)
    %c0_35 = arith.constant 0 : index
    %c0_36 = arith.constant 0 : index
    %106 = vector.load %arg9[%c0_35, %c0_36] : memref<512x128xbf16, #tpu.memory_space<vmem>>, vector<512x128xbf16>
    %cst_37 = arith.constant dense<0.000000e+00> : vector<2x128xf32>
    %107 = tpu.matmul %103, %106, %cst_37 {dimension_numbers = #tpu.dot_dimension_numbers<[1], [0], [0], [1], [0, 0, 1, 1], [], []>} : vector<2x512xbf16>, vector<512x128xbf16>, vector<2x128xf32> -> vector<2x128xf32>
    %108 = vector.extract_strided_slice %6 {offsets = [6, 0], sizes = [1, 128], strides = [1, 1]} : vector<8x512xf32> to vector<1x128xf32>
    %109 = vector.extract_strided_slice %6 {offsets = [7, 0], sizes = [1, 128], strides = [1, 1]} : vector<8x512xf32> to vector<1x128xf32>
    %cst_38 = arith.constant dense<0.000000e+00> : vector<128xf32>
    %110 = vector.multi_reduction <add>, %107, %cst_38 [0] : vector<2x128xf32> to vector<128xf32>
    %111 = vector.shape_cast %110 : vector<128xf32> to vector<1x128xf32>
    %cst_39 = arith.constant 2.000000e+00 : f32
    %112 = vector.broadcast %cst_39 : f32 to vector<1x128xf32>
    %113 = arith.divf %111, %112 : vector<1x128xf32>
    %114 = vector.broadcast %113 : vector<1x128xf32> to vector<2x128xf32>
    %115 = arith.subf %107, %114 : vector<2x128xf32>
    %116 = arith.mulf %115, %115 : vector<2x128xf32>
    %cst_40 = arith.constant dense<0.000000e+00> : vector<128xf32>
    %117 = vector.multi_reduction <add>, %116, %cst_40 [0] : vector<2x128xf32> to vector<128xf32>
    %118 = vector.shape_cast %117 : vector<128xf32> to vector<1x128xf32>
    %cst_41 = arith.constant 2.000000e+00 : f32
    %119 = vector.broadcast %cst_41 : f32 to vector<1x128xf32>
    %120 = arith.divf %118, %119 : vector<1x128xf32>
    %121 = vector.broadcast %113 : vector<1x128xf32> to vector<2x128xf32>
    %122 = arith.subf %107, %121 : vector<2x128xf32>
    %cst_42 = arith.constant 9.99999974E-6 : f32
    %123 = vector.broadcast %cst_42 : f32 to vector<1x128xf32>
    %124 = arith.addf %120, %123 : vector<1x128xf32>
    %125 = math.rsqrt %124 : vector<1x128xf32>
    %126 = vector.broadcast %125 : vector<1x128xf32> to vector<2x128xf32>
    %127 = arith.mulf %122, %126 : vector<2x128xf32>
    %128 = vector.broadcast %108 : vector<1x128xf32> to vector<2x128xf32>
    %129 = arith.mulf %127, %128 : vector<2x128xf32>
    %130 = vector.broadcast %109 : vector<1x128xf32> to vector<2x128xf32>
    %131 = arith.addf %129, %130 : vector<2x128xf32>
    %c0_43 = arith.constant 0 : index
    %c0_44 = arith.constant 0 : index
    %132 = vector.load %arg6[%c0_43, %c0_44] : memref<2x128xf32, #tpu.memory_space<vmem>>, vector<2x128xf32>
    tpu.vector_store %arg6[%c0_43, %c0_44], %131 {strides = array<i32>} : memref<2x128xf32, #tpu.memory_space<vmem>>, vector<2x128xf32>,
    return
  }
}

</mosaic_0001>

<bundles_post_ra>
// kernel: tpu_custom_call.1
= control target key start
LH: loop header
LB: loop body
LE: loop exit
PB: predicated region body
PF: predicated region fallthrough
CT: control target
= control target key end

     0   :  { %11 = vsyncpa [#allocation7], 0  ;;  %s6054_s0 = inlined_call_operand.hbm [shape: f32[2,784], index: 0, kind: input, shape index: {}]   ;;  %s6055_s1 = inlined_call_operand.hbm [shape: bf16[784,512], index: 1, kind: input, shape index: {}]   ;;  %s6056_s2 = inlined_call_operand.hbm [shape: bf16[512,512], index: 2, kind: input, shape index: {}]   ;;  %s6057_s3 = inlined_call_operand.hbm [shape: bf16[512,512], index: 3, kind: input, shape index: {}]   ;;  %s6058_s4 = inlined_call_operand.hbm [shape: bf16[512,128], index: 4, kind: input, shape index: {}]   ;;  %s6059_s5 = inlined_call_operand.hbm [shape: f32[8,512], index: 5, kind: input, shape index: {}]   ;;  %s6060_s6 = inlined_call_operand.hbm [shape: f32[2,128], index: 6, kind: output, shape index: {}]  }
   0x1   :  { %12 = vsyncpa [#allocation10], 0 }
   0x2   :  { %13 = vsyncpa [#allocation8], 0  ;;  %s5768_s21 = smov [#allocation9]  }
   0x3   :  { %s29_s22 = sshll.u32 %s5768_s21, 4  ;;  %s30_s22 = int_to_ptr.vmem [resolvable:$true] %s29_s22 }
   0x4   :  { %s5624_s23 = scalar_lea.vmem %s30_s22, 25088  ;;  %p5629_p1 = scmp.lt.s32.totalorder %s30_s22, %s30_s22 }
   0x5   :  { %p5625_p0 = scmp.ne.s32.totalorder %s30_s22, %s5624_s23  ;;  %p5630_p2 = scmp.lt.s32.totalorder %s5624_s23, %s5624_s23 }
   0x7   :  { %p5631_p3 = por %p5630_p2, %p5629_p1 }
   0x9   :  { %p5632_p4 = pnand %p5631_p3, %p5625_p0 }
   0xb   :  { %5635 = shalt.err (!%p5632_p4)
}
   0xc   :  { %s5769_s24 = smov 256   ;;  %s5770_s25 = smov 16  }
   0xd   :  { %35 = dma.hbm_to_vmem [thread:$0]  %s6055_s1, 25088, %s30_s22, [#allocation10], %s5769_s24, %s5769_s24, %s5770_s25  }
   0xe   :  { %s5771_s28 = smov [#allocation6]   ;;  %s5772_s30 = smov [#allocation11]  }
   0xf   :  { %s20_s29 = sshll.u32 %s5771_s28, 4  ;;  %s42_s7 = sshll.u32 %s5772_s30, 4  ;;  %s21_s29 = int_to_ptr.vmem [resolvable:$true] %s20_s29  ;;  %s43_s7 = int_to_ptr.vmem [resolvable:$true] %s42_s7 }
  0x10   :  { %s5644_s8 = scalar_lea.vmem %s21_s29, 224  ;;  %p5649_p6 = scmp.lt.s32.totalorder %s21_s29, %s21_s29 }
  0x11   :  { %p5645_p5 = scmp.ne.s32.totalorder %s21_s29, %s5644_s8  ;;  %p5650_p7 = scmp.lt.s32.totalorder %s5644_s8, %s5644_s8 }
  0x13   :  { %p5651_p8 = por %p5650_p7, %p5649_p6 }
  0x15   :  { %p5652_p9 = pnand %p5651_p8, %p5645_p5 }
  0x17   :  { %5655 = shalt.err (!%p5652_p9)
}
  0x18   :  { %23 = dma.hbm_to_vmem [thread:$0]  %s6054_s0, 224, %s21_s29, [#allocation7]  }
  0x19   :  { %s5664_s11 = scalar_lea.vmem %s43_s7, 512  ;;  %p5669_p11 = scmp.lt.s32.totalorder %s43_s7, %s43_s7 }
  0x1a   :  { %p5665_p10 = scmp.ne.s32.totalorder %s43_s7, %s5664_s11  ;;  %p5670_p12 = scmp.lt.s32.totalorder %s5664_s11, %s5664_s11 }
  0x1c   :  { %p5671_p13 = por %p5670_p12, %p5669_p11 }
  0x1e   :  { %p5672_p0 = pnand %p5671_p13, %p5665_p10 }
  0x20   :  { %5675 = shalt.err (!%p5672_p0)
}
  0x21   :  { %45 = dma.hbm_to_vmem [thread:$0]  %s6059_s5, 512, %s43_s7, [#allocation10]  }
  0x22   :  { %5756 = dma.done.wait [#allocation7], 224  }
  0x23   :  { %5757 = vsyncadd [#allocation7], 4294967072 }
  0x24   :  { %5758 = dma.done.wait [#allocation10], 25600  }
  0x25   :  { %5759 = vsyncadd [#allocation10], 4294941696  ;;  %v4878_v0 = vld [vmem:[#allocation9 + $0xe4] ss:$16 sps:$4 sm:$0xff]   ;;  %v4882_v2 = vld [vmem:[#allocation9 + $0xe0] ss:$16 sps:$4 sm:$0xff]   ;;  %v103_v38 = vlaneseq }
  0x26   :  { %v4880_v1 = vld [vmem:[#allocation9 + $0x2e4] ss:$16 sps:$4 sm:$0xff]   ;;  %1326 = vmatprep.subr.bf16.mxu0 %v4878_v0  ;;  %v4883_v3 = vld [vmem:[#allocation9 + $0x2e0] ss:$16 sps:$4 sm:$0xff]   ;;  %v5773_v36 = vmov 1983009808  }
  0x27   :  { %1367 = vmatprep.subr.bf16.mxu1 %v4880_v1  ;;  %v4884_v4 = vld [vmem:[#allocation9 + $0xc4] ss:$16 sps:$4 sm:$0xff]   ;;  %1327 = vmatpush1.bf16.msra.mxu0 %v4882_v2  ;;  %v4888_v6 = vld [vmem:[#allocation9 + $0xc0] ss:$16 sps:$4 sm:$0xff]   ;;  %v101_v37 = vunpack.c.l.s4 %v5773_v36  ;;  %v5824_v43 = vshrl.u32 %v103_v38, 7  ;;  %vm1322_vm0 = vcmask 130048  }
  0x28   :  { %1368 = vmatpush1.bf16.msra.mxu1 %v4883_v3  ;;  %v4886_v5 = vld [vmem:[#allocation9 + $0x2c4] ss:$16 sps:$4 sm:$0xff]   ;;  %1328 = vmatprep.subr.bf16.mxu0 %v4884_v4  ;;  %v4889_v7 = vld [vmem:[#allocation9 + $0x2c0] ss:$16 sps:$4 sm:$0xff]   ;;  %v4991_v36 = vld [vmem:[#allocation9 + $0xc8] ss:$16 sps:$4 sm:$0xff]  }
  0x29   :  { %1369 = vmatprep.subr.bf16.mxu1 %v4886_v5  ;;  %v4890_v8 = vld [vmem:[#allocation9 + $0xa4] ss:$16 sps:$4 sm:$0xff]   ;;  %v4894_v10 = vld [vmem:[#allocation9 + $0xa0] ss:$16 sps:$4 sm:$0xff]   ;;  %v102_v42 = vunpack.c.0.s8 %v101_v37  ;;  %v4999_v38 = vld [vmem:[#allocation9 + $0xac] ss:$16 sps:$4 sm:$0xff]  }
  0x2a   :  { %v4892_v9 = vld [vmem:[#allocation9 + $0x2a4] ss:$16 sps:$4 sm:$0xff]   ;;  %v4895_v11 = vld [vmem:[#allocation9 + $0x2a0] ss:$16 sps:$4 sm:$0xff]   ;;  %vm1654_vm1 = vcmask 1041408   ;;  %s5775_s0 = smov [#allocation2]  }
  0x2b   :  { %1329 = vmatpush1.bf16.msra.mxu0 %v4888_v6  ;;  %v4896_v12 = vld [vmem:[#allocation9 + $0x84] ss:$16 sps:$4 sm:$0xff]   ;;  %v4900_v14 = vld [vmem:[#allocation9 + $0x80] ss:$16 sps:$4 sm:$0xff]   ;;  %v5827_v49 = vsub.s32 %v102_v42, %v5824_v43  ;;  %v5005_v42 = vld [vmem:[#allocation9 + $0x8c] ss:$16 sps:$4 sm:$0xff]  }
  0x2c   :  { %1370 = vmatpush1.bf16.msra.mxu1 %v4889_v7  ;;  %1330 = vmatprep.subr.bf16.mxu0 %v4890_v8  ;;  %v4898_v13 = vld [vmem:[#allocation9 + $0x284] ss:$16 sps:$4 sm:$0xff]   ;;  %v4901_v15 = vld [vmem:[#allocation9 + $0x280] ss:$16 sps:$4 sm:$0xff]   ;;  %s63_s5 = sshll.u32 %s5775_s0, 4  ;;  %s5776_s13 = smov [#allocation3]   ;;  %s64_s5 = int_to_ptr.vmem [resolvable:$true] %s63_s5 }
  0x2d   :  { %1371 = vmatprep.subr.bf16.mxu1 %v4892_v9  ;;  %v4902_v16 = vld [vmem:[#allocation9 + $0x64] ss:$16 sps:$4 sm:$0xff]   ;;  %v4906_v18 = vld [vmem:[#allocation9 + $0x60] ss:$16 sps:$4 sm:$0xff]   ;;  %s75_s14 = sshll.u32 %s5776_s13, 4  ;;  %s5684_s15 = scalar_lea.vmem %s64_s5, 16384  ;;  %s76_s14 = int_to_ptr.vmem [resolvable:$true] %s75_s14 }
  0x2e   :  { %v4904_v17 = vld [vmem:[#allocation9 + $0x264] ss:$16 sps:$4 sm:$0xff]   ;;  %v4907_v19 = vld [vmem:[#allocation9 + $0x260] ss:$16 sps:$4 sm:$0xff]   ;;  %p5685_p1 = scmp.ne.s32.totalorder %s64_s5, %s5684_s15  ;;  %p5689_p2 = scmp.lt.s32.totalorder %s64_s5, %s64_s5 }
  0x2f   :  { %1331 = vmatpush1.bf16.msra.mxu0 %v4894_v10  ;;  %v4908_v20 = vld [vmem:[#allocation9 + $0x44] ss:$16 sps:$4 sm:$0xff]   ;;  %v4912_v22 = vld [vmem:[#allocation9 + $0x40] ss:$16 sps:$4 sm:$0xff]   ;;  %p5690_p3 = scmp.lt.s32.totalorder %s5684_s15, %s5684_s15 }
  0x30   :  { %1372 = vmatpush1.bf16.msra.mxu1 %v4895_v11  ;;  %1332 = vmatprep.subr.bf16.mxu0 %v4896_v12  ;;  %v4910_v21 = vld [vmem:[#allocation9 + $0x244] ss:$16 sps:$4 sm:$0xff]   ;;  %v4913_v23 = vld [vmem:[#allocation9 + $0x240] ss:$16 sps:$4 sm:$0xff]   ;;  %v96_v12 = vld [vmem:[#allocation6 + $0x8] sm:$0x3f] }
  0x31   :  { %1373 = vmatprep.subr.bf16.mxu1 %v4898_v13  ;;  %v4914_v24 = vld [vmem:[#allocation9 + $0x24] ss:$16 sps:$4 sm:$0xff]   ;;  %v4918_v26 = vld [vmem:[#allocation9 + $0x20] ss:$16 sps:$4 sm:$0xff]   ;;  %v5838_v13 = vrot.slane %v96_v12, %v5827_v49  ;;  %p5691_p4 = por %p5690_p3, %p5689_p2 }
  0x32   :  { %v4916_v25 = vld [vmem:[#allocation9 + $0x224] ss:$16 sps:$4 sm:$0xff]   ;;  %v4919_v27 = vld [vmem:[#allocation9 + $0x220] ss:$16 sps:$4 sm:$0xff]  }
  0x33   :  { %1333 = vmatpush1.bf16.msra.mxu0 %v4900_v14  ;;  %v4920_v28 = vld [vmem:[#allocation9 + $0x4] ss:$16 sps:$4 sm:$0xff]   ;;  %v4924_v30 = vld [vmem:[#allocation9] ss:$16 sps:$4 sm:$0xff]   ;;  %p5692_p5 = pnand %p5691_p4, %p5685_p1 }
  0x34   :  { %1374 = vmatpush1.bf16.msra.mxu1 %v4901_v15  ;;  %1334 = vmatprep.subr.bf16.mxu0 %v4902_v16  ;;  %v4922_v29 = vld [vmem:[#allocation9 + $0x204] ss:$16 sps:$4 sm:$0xff]   ;;  %v4925_v31 = vld [vmem:[#allocation9 + $0x200] ss:$16 sps:$4 sm:$0xff]  }
  0x35   :  { %1375 = vmatprep.subr.bf16.mxu1 %v4904_v17  ;;  %v4926_v32 = vld [vmem:[#allocation9 + $0x1e4] ss:$16 sps:$4 sm:$0xff]   ;;  %v4930_v34 = vld [vmem:[#allocation9 + $0x1e0] ss:$16 sps:$4 sm:$0xff]  }
  0x36   :  { %v4928_v33 = vld [vmem:[#allocation9 + $0x3e4] ss:$16 sps:$4 sm:$0xff]   ;;  %v4931_v35 = vld [vmem:[#allocation9 + $0x3e0] ss:$16 sps:$4 sm:$0xff]  }
  0x37   :  { %1335 = vmatpush1.bf16.msra.mxu0 %v4906_v18  ;;  %v4932_v39 = vld [vmem:[#allocation9 + $0x1c4] ss:$16 sps:$4 sm:$0xff]   ;;  %v4936_v41 = vld [vmem:[#allocation9 + $0x1c0] ss:$16 sps:$4 sm:$0xff]   ;;  %v131_v18 = vcombine.high %v5838_v13, %v5838_v13 }
  0x38   :  { %1376 = vmatpush1.bf16.msra.mxu1 %v4907_v19  ;;  %1336 = vmatprep.subr.bf16.mxu0 %v4908_v20  ;;  %v4934_v40 = vld [vmem:[#allocation9 + $0x3c4] ss:$16 sps:$4 sm:$0xff]   ;;  %v4937_v44 = vld [vmem:[#allocation9 + $0x3c0] ss:$16 sps:$4 sm:$0xff]  }
  0x39   :  { %1377 = vmatprep.subr.bf16.mxu1 %v4910_v21  ;;  %v4938_v45 = vld [vmem:[#allocation9 + $0x1a4] ss:$16 sps:$4 sm:$0xff]   ;;  %v4942_v47 = vld [vmem:[#allocation9 + $0x1a0] ss:$16 sps:$4 sm:$0xff]   ;;  %v116_v21 = vcombine.high %v96_v12, %v96_v12  ;;  %v5053_v12 = vld [vmem:[#allocation9 + $0x18c] ss:$16 sps:$4 sm:$0xff]  }
  0x3a   :  { %v4940_v46 = vld [vmem:[#allocation9 + $0x3a4] ss:$16 sps:$4 sm:$0xff]   ;;  %v4943_v48 = vld [vmem:[#allocation9 + $0x3a0] ss:$16 sps:$4 sm:$0xff]  }
  0x3b   :  { %1337 = vmatpush1.bf16.msra.mxu0 %v4912_v22  ;;  %v4944_v50 = vld [vmem:[#allocation9 + $0x184] ss:$16 sps:$4 sm:$0xff]   ;;  %v4948_v53 = vld [vmem:[#allocation9 + $0x180] ss:$16 sps:$4 sm:$0xff]  }
  0x3c   :  { %1378 = vmatpush1.bf16.msra.mxu1 %v4913_v23  ;;  %1338 = vmatprep.subr.bf16.mxu0 %v4914_v24  ;;  %v4946_v51 = vld [vmem:[#allocation9 + $0x384] ss:$16 sps:$4 sm:$0xff]   ;;  %v4949_v56 = vld [vmem:[#allocation9 + $0x380] ss:$16 sps:$4 sm:$0xff]  }
  0x3d   :  { %1379 = vmatprep.subr.bf16.mxu1 %v4916_v25  ;;  %v95_v52 = vld [vmem:[#allocation6] sm:$0xff]  ;;  %v4986_v25 = vld [vmem:[#allocation9 + $0xec] ss:$16 sps:$4 sm:$0xff]  }
  0x3e   :  { %v106_v54 = vrot.slane %v95_v52, %v5827_v49  ;;  %v99_v55 = vcombine.high %v95_v52, %v95_v52  ;;  %v4950_v57 = vld [vmem:[#allocation9 + $0x164] ss:$16 sps:$4 sm:$0xff]   ;;  %v4954_v61 = vld [vmem:[#allocation9 + $0x160] ss:$16 sps:$4 sm:$0xff]  }
  0x3f   :  { %1339 = vmatpush1.bf16.msra.mxu0 %v4918_v26  ;;  %v4952_v58 = vld [vmem:[#allocation9 + $0x364] ss:$16 sps:$4 sm:$0xff]   ;;  %v4955_v0 = vld [vmem:[#allocation9 + $0x360] ss:$16 sps:$4 sm:$0xff]   ;;  %v5846_v26 = vpack.c.bf16 %v131_v18, %v131_v18 }
  0x40   :  { %1380 = vmatpush1.bf16.msra.mxu1 %v4919_v27  ;;  %1340 = vmatprep.subr.bf16.mxu0 %v4920_v28  ;;  %v114_v59 = vcombine.high %v106_v54, %v106_v54  ;;  %v113_v60 = vrot.slane %v99_v55, %v5827_v49  ;;  %v4956_v1 = vld [vmem:[#allocation9 + $0x144] ss:$16 sps:$4 sm:$0xff]   ;;  %v4960_v4 = vld [vmem:[#allocation9 + $0x140] ss:$16 sps:$4 sm:$0xff]   ;;  %v5842_v19 = vpack.c.bf16 %v106_v54, %v106_v54  ;;  %v5023_v55 = vld [vmem:[#allocation9 + $0x2c] ss:$16 sps:$4 sm:$0xff]  }
  0x41   :  { %1381 = vmatprep.subr.bf16.mxu1 %v4922_v29  ;;  %v4958_v2 = vld [vmem:[#allocation9 + $0x344] ss:$16 sps:$4 sm:$0xff]   ;;  %v4961_v5 = vld [vmem:[#allocation9 + $0x340] ss:$16 sps:$4 sm:$0xff]   ;;  %v130_v27 = vrot.slane %v116_v21, %v5827_v49  ;;  %v5774_v29 = vmov 0  }
  0x42   :  { %v5831_v62 = vpack.c.bf16 %v114_v59, %v114_v59  ;;  %v115_v63 = vcombine.high %v113_v60, %v113_v60  ;;  %v4962_v6 = vld [vmem:[#allocation9 + $0x124] ss:$16 sps:$4 sm:$0xff]   ;;  %v4966_v8 = vld [vmem:[#allocation9 + $0x120] ss:$16 sps:$4 sm:$0xff]   ;;  %v5844_v20 = vpack.c.bf16 %v113_v60, %v113_v60  ;;  %v5009_v49 = vld [vmem:[#allocation9 + $0x68] ss:$16 sps:$4 sm:$0xff]  }
  0x43   :  { %1341 = vmatpush1.bf16.msra.mxu0 %v4924_v30  ;;  %v4964_v7 = vld [vmem:[#allocation9 + $0x324] ss:$16 sps:$4 sm:$0xff]   ;;  %v4967_v9 = vld [vmem:[#allocation9 + $0x320] ss:$16 sps:$4 sm:$0xff]   ;;  %v5029_v59 = vld [vmem:[#allocation9 + $0xc] ss:$16 sps:$4 sm:$0xff]  }
  0x44   :  { %1382 = vmatpush1.bf16.msra.mxu1 %v4925_v31  ;;  %1342 = vmatprep.subr.bf16.mxu0 %v4926_v32  ;;  %v5833_v3 = vpack.c.bf16 %v115_v63, %v115_v63  ;;  %v4968_v10 = vld [vmem:[#allocation9 + $0x104] ss:$16 sps:$4 sm:$0xff]   ;;  %v4972_v14 = vld [vmem:[#allocation9 + $0x100] ss:$16 sps:$4 sm:$0xff]   ;;  %v5853_v31 = vpack.c.bf16 %v130_v27, %v130_v27  ;;  %v4984_v32 = vld [vmem:[#allocation9 + $0xe8] ss:$16 sps:$4 sm:$0xff]  }
  0x45   :  { %1383 = vmatprep.subr.bf16.mxu1 %v4928_v33  ;;  %1358 = vmatprep.mubr.bf16.mxu0 %v5831_v62  ;;  %v4970_v11 = vld [vmem:[#allocation9 + $0x304] ss:$16 sps:$4 sm:$0xff]   ;;  %v4973_v15 = vld [vmem:[#allocation9 + $0x300] ss:$16 sps:$4 sm:$0xff]   ;;  %v5035_v63 = vld [vmem:[#allocation9 + $0x1ec] ss:$16 sps:$4 sm:$0xff]  }
  0x46   :  { %1399 = vmatprep.mubr.bf16.mxu1 %v5833_v3  ;;  %v4977_v16 = vld [vmem:[#allocation9 + $0x4e4] ss:$16 sps:$4 sm:$0xff]   ;;  %v4975_v22 = vld [vmem:[#allocation9 + $0x4e0] ss:$16 sps:$4 sm:$0xff]   ;;  %v5057_v21 = vld [vmem:[#allocation9 + $0x168] ss:$16 sps:$4 sm:$0xff]  }
  0x47   :  { %1343 = vmatpush2.bf16.msra.mxu0 %v4930_v34  ;;  %v4980_v17 = vld [vmem:[#allocation9 + $0x604] ss:$16 sps:$4 sm:$0xff]   ;;  %v4978_v23 = vld [vmem:[#allocation9 + $0x600] ss:$16 sps:$4 sm:$0xff]   ;;  %v4993_v34 = vld [vmem:[#allocation9 + $0xcc] ss:$16 sps:$4 sm:$0xff]  }
  0x48   :  { %1384 = vmatpush2.bf16.msra.mxu1 %v4931_v35  ;;  %1344 = vmatprep.subr.bf16.mxu0 %v4932_v39  ;;  %v4983_v24 = vld [vmem:[#allocation9 + $0x4c4] ss:$16 sps:$4 sm:$0xff]   ;;  %v4981_v28 = vld [vmem:[#allocation9 + $0x4c0] ss:$16 sps:$4 sm:$0xff]  }
  0x49   :  { %1385 = vmatprep.subr.bf16.mxu1 %v4934_v40  ;;  %v4989_v30 = vld [vmem:[#allocation9 + $0x4a4] ss:$16 sps:$4 sm:$0xff]   ;;  %v4987_v33 = vld [vmem:[#allocation9 + $0x4a0] ss:$16 sps:$4 sm:$0xff]   ;;  %v4997_v40 = vld [vmem:[#allocation9 + $0xa8] ss:$16 sps:$4 sm:$0xff]  }
  0x4a   :  { %v4996_v35 = vld [vmem:[#allocation9 + $0x484] ss:$16 sps:$4 sm:$0xff]   ;;  %v4994_v37 = vld [vmem:[#allocation9 + $0x480] ss:$16 sps:$4 sm:$0xff]  }
  0x4b   :  { %1345 = vmatpush2.bf16.msra.mxu0 %v4936_v41  ;;  %v5002_v39 = vld [vmem:[#allocation9 + $0x464] ss:$16 sps:$4 sm:$0xff]   ;;  %v5000_v41 = vld [vmem:[#allocation9 + $0x460] ss:$16 sps:$4 sm:$0xff]  }
  0x4c   :  { %1386 = vmatpush2.bf16.msra.mxu1 %v4937_v44  ;;  %1346 = vmatprep.subr.bf16.mxu0 %v4938_v45  ;;  %v5008_v44 = vld [vmem:[#allocation9 + $0x444] ss:$16 sps:$4 sm:$0xff]   ;;  %v5003_v45 = vld [vmem:[#allocation9 + $0x88] ss:$16 sps:$4 sm:$0xff]   ;;  %v5018_v54 = vld [vmem:[#allocation9 + $0x400] ss:$16 sps:$4 sm:$0xff]  }
  0x4d   :  { %1387 = vmatprep.subr.bf16.mxu1 %v4940_v46  ;;  %v5006_v46 = vld [vmem:[#allocation9 + $0x440] ss:$16 sps:$4 sm:$0xff]   ;;  %v5020_v52 = vld [vmem:[#allocation9 + $0x404] ss:$16 sps:$4 sm:$0xff]  }
  0x4e   :  { %v5032_v60 = vld [vmem:[#allocation9 + $0x5c4] ss:$16 sps:$4 sm:$0xff]   ;;  %v5066_v27 = vld [vmem:[#allocation9 + $0x500] ss:$16 sps:$4 sm:$0xff]  }
  0x4f   :  { %1347 = vmatpush2.bf16.msra.mxu0 %v4942_v47  ;;  %v5011_v47 = vld [vmem:[#allocation9 + $0x6c] ss:$16 sps:$4 sm:$0xff]   ;;  %v5062_v18 = vld [vmem:[#allocation9 + $0x524] ss:$16 sps:$4 sm:$0xff]  }
  0x50   :  { %1388 = vmatpush2.bf16.msra.mxu1 %v4943_v48  ;;  %1348 = vmatprep.subr.bf16.mxu0 %v4944_v50  ;;  %v5014_v48 = vld [vmem:[#allocation9 + $0x424] ss:$16 sps:$4 sm:$0xff]   ;;  %v5012_v50 = vld [vmem:[#allocation9 + $0x420] ss:$16 sps:$4 sm:$0xff]  }
  0x51   :  { %1389 = vmatprep.subr.bf16.mxu1 %v4946_v51  ;;  %v5017_v51 = vld [vmem:[#allocation9 + $0x4c] ss:$16 sps:$4 sm:$0xff]  }
  0x53   :  { %1349 = vmatpush2.bf16.msra.mxu0 %v4948_v53  ;;  %v5015_v53 = vld [vmem:[#allocation9 + $0x48] ss:$16 sps:$4 sm:$0xff]  }
  0x54   :  { %1390 = vmatpush2.bf16.msra.mxu1 %v4949_v56  ;;  %1350 = vmatprep.subr.bf16.mxu0 %v4950_v57  ;;  %v5026_v56 = vld [vmem:[#allocation9 + $0x5e4] ss:$16 sps:$4 sm:$0xff]   ;;  %v5021_v57 = vld [vmem:[#allocation9 + $0x28] ss:$16 sps:$4 sm:$0xff]  }
  0x55   :  { %1391 = vmatprep.subr.bf16.mxu1 %v4952_v58  ;;  %v5024_v58 = vld [vmem:[#allocation9 + $0x5e0] ss:$16 sps:$4 sm:$0xff]  }
  0x57   :  { %1351 = vmatpush2.bf16.msra.mxu0 %v4954_v61  ;;  %v5027_v61 = vld [vmem:[#allocation9 + $0x8] ss:$16 sps:$4 sm:$0xff]  }
  0x58   :  { %1392 = vmatpush2.bf16.msra.mxu1 %v4955_v0  ;;  %1352 = vmatprep.subr.bf16.mxu0 %v4956_v1  ;;  %v5038_v0 = vld [vmem:[#allocation9 + $0x5a4] ss:$16 sps:$4 sm:$0xff]   ;;  %v5033_v1 = vld [vmem:[#allocation9 + $0x1e8] ss:$16 sps:$4 sm:$0xff]  }
  0x59   :  { %1393 = vmatprep.subr.bf16.mxu1 %v4958_v2  ;;  %v5036_v2 = vld [vmem:[#allocation9 + $0x5a0] ss:$16 sps:$4 sm:$0xff]  }
  0x5b   :  { %1353 = vmatpush2.bf16.msra.mxu0 %v4960_v4  ;;  %v5041_v4 = vld [vmem:[#allocation9 + $0x1cc] ss:$16 sps:$4 sm:$0xff]  }
  0x5c   :  { %1394 = vmatpush2.bf16.msra.mxu1 %v4961_v5  ;;  %1354 = vmatprep.subr.bf16.mxu0 %v4962_v6  ;;  %v5044_v5 = vld [vmem:[#allocation9 + $0x584] ss:$16 sps:$4 sm:$0xff]   ;;  %v5039_v6 = vld [vmem:[#allocation9 + $0x1c8] ss:$16 sps:$4 sm:$0xff]  }
  0x5d   :  { %1395 = vmatprep.subr.bf16.mxu1 %v4964_v7  ;;  %v5042_v7 = vld [vmem:[#allocation9 + $0x580] ss:$16 sps:$4 sm:$0xff]  }
  0x5f   :  { %1355 = vmatpush2.bf16.msra.mxu0 %v4966_v8  ;;  %v5047_v8 = vld [vmem:[#allocation9 + $0x1ac] ss:$16 sps:$4 sm:$0xff]  }
  0x60   :  { %1396 = vmatpush2.bf16.msra.mxu1 %v4967_v9  ;;  %1356 = vmatprep.subr.bf16.mxu0 %v4968_v10  ;;  %v5050_v9 = vld [vmem:[#allocation9 + $0x564] ss:$16 sps:$4 sm:$0xff]   ;;  %v5045_v10 = vld [vmem:[#allocation9 + $0x1a8] ss:$16 sps:$4 sm:$0xff]  }
  0x61   :  { %1397 = vmatprep.subr.bf16.mxu1 %v4970_v11  ;;  %v5048_v11 = vld [vmem:[#allocation9 + $0x560] ss:$16 sps:$4 sm:$0xff]  }
  0x63   :  { %1357 = vmatpush2.bf16.msra.mxu0 %v4972_v14  ;;  %v5056_v14 = vld [vmem:[#allocation9 + $0x544] ss:$16 sps:$4 sm:$0xff]  }
  0x64   :  { %1398 = vmatpush2.bf16.msra.mxu1 %v4973_v15  ;;  %1408 = vmatprep.subr.bf16.mxu0 %v4977_v16  ;;  %v5051_v15 = vld [vmem:[#allocation9 + $0x188] ss:$16 sps:$4 sm:$0xff]   ;;  %v5054_v16 = vld [vmem:[#allocation9 + $0x540] ss:$16 sps:$4 sm:$0xff]  }
  0x65   :  { %1463 = vmatprep.subr.bf16.mxu1 %v4980_v17  ;;  %v5059_v17 = vld [vmem:[#allocation9 + $0x16c] ss:$16 sps:$4 sm:$0xff]  }
  0x66   :  { %1359 = vmatmul.mubr.bf16.vlgmr.msra.gmra.mxu0 %v5842_v19 }
  0x67   :  { %1400 = vmatmul.mubr.bf16.vlgmr.msra.gmra.mxu1 %v5844_v20  ;;  %1409 = vmatpush1.bf16.msra.mxu0 %v4975_v22  ;;  %v5060_v22 = vld [vmem:[#allocation9 + $0x520] ss:$16 sps:$4 sm:$0xff]  }
  0x68   :  { %1464 = vmatpush1.bf16.msra.mxu1 %v4978_v23  ;;  %1410 = vmatprep.subr.bf16.mxu0 %v4983_v24  ;;  %v5065_v23 = vld [vmem:[#allocation9 + $0x14c] ss:$16 sps:$4 sm:$0xff]   ;;  %v5068_v24 = vld [vmem:[#allocation9 + $0x504] ss:$16 sps:$4 sm:$0xff]  }
  0x69   :  { %1481 = vmatprep.mubr.bf16.mxu1 %v5774_v29  ;;  %1490 = vmatprep.subr.bf16.mxu1 %v4986_v25  ;;  %v5063_v25 = vld [vmem:[#allocation9 + $0x148] ss:$16 sps:$4 sm:$0xff]  }
  0x6a   :  { %1440 = vmatprep.mubr.bf16.mxu0 %v5846_v26 }
  0x6b   :  { %1411 = vmatpush1.bf16.msra.mxu0 %v4981_v28  ;;  %v5071_v28 = vld [vmem:[#allocation9 + $0x12c] ss:$16 sps:$4 sm:$0xff]  }
  0x6c   :  { %1412 = vmatprep.subr.bf16.mxu0 %v4989_v30  ;;  %v5074_v30 = vld [vmem:[#allocation9 + $0x2ec] ss:$16 sps:$4 sm:$0xff]  }
  0x6f   :  { %4529 = vmatmul.mubr.msk.bf16.vlgmr.msra.gmra.mxu1 %vm1322_vm0, %v5853_v31  ;;  %1413 = vmatpush1.bf16.msra.mxu0 %v4987_v33  ;;  %v5069_v33 = vld [vmem:[#allocation9 + $0x128] ss:$16 sps:$4 sm:$0xff]  }
  0x70   :  { %1491 = vmatpush1.bf16.msra.mxu1 %v4984_v32  ;;  %1414 = vmatprep.subr.bf16.mxu0 %v4996_v35  ;;  %v5860_v32 = vpack.c.bf16 %v5838_v13, %v5838_v13  ;;  %v5077_v35 = vld [vmem:[#allocation9 + $0x10c] ss:$16 sps:$4 sm:$0xff]   ;;  %v5081_v13 = vld [vmem:[#allocation9 + $0x4e8] ss:$16 sps:$4 sm:$0xff]  }
  0x71   :  { %1492 = vmatprep.subr.bf16.mxu1 %v4993_v34  ;;  %1522 = vmatprep.mubr.bf16.mxu1 %v5831_v62  ;;  %v5030_v62 = vld [vmem:[#allocation9 + $0x5c0] ss:$16 sps:$4 sm:$0xff]   ;;  %v5072_v34 = vld [vmem:[#allocation9 + $0x2e8] ss:$16 sps:$4 sm:$0xff]  }
  0x73   :  { %1415 = vmatpush1.bf16.msra.mxu0 %v4994_v37  ;;  %v5075_v37 = vld [vmem:[#allocation9 + $0x108] ss:$16 sps:$4 sm:$0xff]  }
  0x74   :  { %1493 = vmatpush1.bf16.msra.mxu1 %v4991_v36  ;;  %1416 = vmatprep.subr.bf16.mxu0 %v5002_v39  ;;  %v5080_v36 = vld [vmem:[#allocation9 + $0x2cc] ss:$16 sps:$4 sm:$0xff]  }
  0x75   :  { %1494 = vmatprep.subr.bf16.mxu1 %v4999_v38  ;;  %v5078_v38 = vld [vmem:[#allocation9 + $0x2c8] ss:$16 sps:$4 sm:$0xff]   ;;  %v5083_v39 = vld [vmem:[#allocation9 + $0x4ec] ss:$16 sps:$4 sm:$0xff]  }
  0x77   :  { %1417 = vmatpush1.bf16.msra.mxu0 %v5000_v41  ;;  %v5084_v41 = vld [vmem:[#allocation9 + $0x2a8] ss:$16 sps:$4 sm:$0xff]  }
  0x78   :  { %1495 = vmatpush1.bf16.msra.mxu1 %v4997_v40  ;;  %1418 = vmatprep.subr.bf16.mxu0 %v5008_v44  ;;  %v5086_v40 = vld [vmem:[#allocation9 + $0x2ac] ss:$16 sps:$4 sm:$0xff]  }
  0x79   :  { %1496 = vmatprep.subr.bf16.mxu1 %v5005_v42  ;;  %v5089_v42 = vld [vmem:[#allocation9 + $0x4cc] ss:$16 sps:$4 sm:$0xff]  }
  0x7a   :  { %v5092_v44 = vld [vmem:[#allocation9 + $0x28c] ss:$16 sps:$4 sm:$0xff]  }
  0x7b   :  { %1419 = vmatpush1.bf16.msra.mxu0 %v5006_v46  ;;  %v5090_v46 = vld [vmem:[#allocation9 + $0x288] ss:$16 sps:$4 sm:$0xff]  }
  0x7c   :  { %1497 = vmatpush1.bf16.msra.mxu1 %v5003_v45  ;;  %1420 = vmatprep.subr.bf16.mxu0 %v5014_v48  ;;  %v5087_v45 = vld [vmem:[#allocation9 + $0x4c8] ss:$16 sps:$4 sm:$0xff]   ;;  %v5098_v48 = vld [vmem:[#allocation9 + $0x26c] ss:$16 sps:$4 sm:$0xff]  }
  0x7d   :  { %1498 = vmatprep.subr.bf16.mxu1 %v5011_v47  ;;  %v5095_v47 = vld [vmem:[#allocation9 + $0x4ac] ss:$16 sps:$4 sm:$0xff]  }
  0x7f   :  { %1421 = vmatpush1.bf16.msra.mxu0 %v5012_v50  ;;  %v5101_v50 = vld [vmem:[#allocation9 + $0x48c] ss:$16 sps:$4 sm:$0xff]  }
  0x80   :  { %1499 = vmatpush1.bf16.msra.mxu1 %v5009_v49  ;;  %1422 = vmatprep.subr.bf16.mxu0 %v5020_v52  ;;  %v5096_v49 = vld [vmem:[#allocation9 + $0x268] ss:$16 sps:$4 sm:$0xff]  }
  0x81   :  { %1500 = vmatprep.subr.bf16.mxu1 %v5017_v51  ;;  %v5104_v51 = vld [vmem:[#allocation9 + $0x24c] ss:$16 sps:$4 sm:$0xff]   ;;  %v5102_v52 = vld [vmem:[#allocation9 + $0x248] ss:$16 sps:$4 sm:$0xff]  }
  0x83   :  { %1423 = vmatpush1.bf16.msra.mxu0 %v5018_v54  ;;  %v5110_v54 = vld [vmem:[#allocation9 + $0x22c] ss:$16 sps:$4 sm:$0xff]  }
  0x84   :  { %1501 = vmatpush1.bf16.msra.mxu1 %v5015_v53  ;;  %1424 = vmatprep.subr.bf16.mxu0 %v5026_v56  ;;  %v5107_v53 = vld [vmem:[#allocation9 + $0x46c] ss:$16 sps:$4 sm:$0xff]  }
  0x85   :  { %1502 = vmatprep.subr.bf16.mxu1 %v5023_v55  ;;  %v5105_v55 = vld [vmem:[#allocation9 + $0x468] ss:$16 sps:$4 sm:$0xff]   ;;  %v5113_v56 = vld [vmem:[#allocation9 + $0x44c] ss:$16 sps:$4 sm:$0xff]  }
  0x87   :  { %1425 = vmatpush2.bf16.msra.mxu0 %v5024_v58  ;;  %v5111_v58 = vld [vmem:[#allocation9 + $0x448] ss:$16 sps:$4 sm:$0xff]  }
  0x88   :  { %1503 = vmatpush1.bf16.msra.mxu1 %v5021_v57  ;;  %1426 = vmatprep.subr.bf16.mxu0 %v5032_v60  ;;  %v5116_v57 = vld [vmem:[#allocation9 + $0x20c] ss:$16 sps:$4 sm:$0xff]  }
  0x89   :  { %1504 = vmatprep.subr.bf16.mxu1 %v5029_v59  ;;  %v5114_v59 = vld [vmem:[#allocation9 + $0x208] ss:$16 sps:$4 sm:$0xff]   ;;  %v5119_v60 = vld [vmem:[#allocation9 + $0x42c] ss:$16 sps:$4 sm:$0xff]  }
  0x8b   :  { %1427 = vmatpush2.bf16.msra.mxu0 %v5030_v62  ;;  %v5117_v62 = vld [vmem:[#allocation9 + $0x428] ss:$16 sps:$4 sm:$0xff]  }
  0x8c   :  { %1505 = vmatpush1.bf16.msra.mxu1 %v5027_v61  ;;  %1428 = vmatprep.subr.bf16.mxu0 %v5038_v0  ;;  %v5122_v61 = vld [vmem:[#allocation9 + $0x3ec] ss:$16 sps:$4 sm:$0xff]  }
  0x8d   :  { %1506 = vmatprep.subr.bf16.mxu1 %v5035_v63  ;;  %v5120_v63 = vld [vmem:[#allocation9 + $0x3e8] ss:$16 sps:$4 sm:$0xff]   ;;  %v5125_v0 = vld [vmem:[#allocation9 + $0x40c] ss:$16 sps:$4 sm:$0xff]  }
  0x8f   :  { %1429 = vmatpush2.bf16.msra.mxu0 %v5036_v2  ;;  %v5123_v2 = vld [vmem:[#allocation9 + $0x408] ss:$16 sps:$4 sm:$0xff]  }
  0x90   :  { %1507 = vmatpush2.bf16.msra.mxu1 %v5033_v1  ;;  %1430 = vmatprep.subr.bf16.mxu0 %v5044_v5  ;;  %v5128_v1 = vld [vmem:[#allocation9 + $0x3cc] ss:$16 sps:$4 sm:$0xff]  }
  0x91   :  { %1508 = vmatprep.subr.bf16.mxu1 %v5041_v4  ;;  %v5126_v4 = vld [vmem:[#allocation9 + $0x3c8] ss:$16 sps:$4 sm:$0xff]   ;;  %v5131_v5 = vld [vmem:[#allocation9 + $0x5ec] ss:$16 sps:$4 sm:$0xff]  }
  0x93   :  { %1431 = vmatpush2.bf16.msra.mxu0 %v5042_v7  ;;  %v5129_v7 = vld [vmem:[#allocation9 + $0x5e8] ss:$16 sps:$4 sm:$0xff]  }
  0x94   :  { %1509 = vmatpush2.bf16.msra.mxu1 %v5039_v6  ;;  %1432 = vmatprep.subr.bf16.mxu0 %v5050_v9  ;;  %v5134_v6 = vld [vmem:[#allocation9 + $0x3ac] ss:$16 sps:$4 sm:$0xff]  }
  0x95   :  { %1510 = vmatprep.subr.bf16.mxu1 %v5047_v8  ;;  %v5132_v8 = vld [vmem:[#allocation9 + $0x3a8] ss:$16 sps:$4 sm:$0xff]   ;;  %v5137_v9 = vld [vmem:[#allocation9 + $0x5cc] ss:$16 sps:$4 sm:$0xff]  }
  0x97   :  { %1433 = vmatpush2.bf16.msra.mxu0 %v5048_v11  ;;  %v5135_v11 = vld [vmem:[#allocation9 + $0x5c8] ss:$16 sps:$4 sm:$0xff]  }
  0x98   :  { %1511 = vmatpush2.bf16.msra.mxu1 %v5045_v10  ;;  %1434 = vmatprep.subr.bf16.mxu0 %v5056_v14  ;;  %v5140_v10 = vld [vmem:[#allocation9 + $0x38c] ss:$16 sps:$4 sm:$0xff]  }
  0x99   :  { %1512 = vmatprep.subr.bf16.mxu1 %v5053_v12  ;;  %v5138_v12 = vld [vmem:[#allocation9 + $0x388] ss:$16 sps:$4 sm:$0xff]   ;;  %v5143_v14 = vld [vmem:[#allocation9 + $0x5ac] ss:$16 sps:$4 sm:$0xff]  }
  0x9b   :  { %1435 = vmatpush2.bf16.msra.mxu0 %v5054_v16  ;;  %v5141_v16 = vld [vmem:[#allocation9 + $0x5a8] ss:$16 sps:$4 sm:$0xff]  }
  0x9c   :  { %1513 = vmatpush2.bf16.msra.mxu1 %v5051_v15  ;;  %1436 = vmatprep.subr.bf16.mxu0 %v5062_v18  ;;  %v5146_v15 = vld [vmem:[#allocation9 + $0x36c] ss:$16 sps:$4 sm:$0xff]  }
  0x9d   :  { %1514 = vmatprep.subr.bf16.mxu1 %v5059_v17  ;;  %v5144_v17 = vld [vmem:[#allocation9 + $0x368] ss:$16 sps:$4 sm:$0xff]   ;;  %v5149_v18 = vld [vmem:[#allocation9 + $0x58c] ss:$16 sps:$4 sm:$0xff]  }
  0x9f   :  { %1437 = vmatpush2.bf16.msra.mxu0 %v5060_v22  ;;  %v5147_v22 = vld [vmem:[#allocation9 + $0x588] ss:$16 sps:$4 sm:$0xff]  }
  0xa0   :  { %1515 = vmatpush2.bf16.msra.mxu1 %v5057_v21  ;;  %1438 = vmatprep.subr.bf16.mxu0 %v5068_v24  ;;  %v5152_v21 = vld [vmem:[#allocation9 + $0x34c] ss:$16 sps:$4 sm:$0xff]  }
  0xa1   :  { %1516 = vmatprep.subr.bf16.mxu1 %v5065_v23  ;;  %v5150_v23 = vld [vmem:[#allocation9 + $0x348] ss:$16 sps:$4 sm:$0xff]   ;;  %v5155_v24 = vld [vmem:[#allocation9 + $0x56c] ss:$16 sps:$4 sm:$0xff]  }
  0xa3   :  { %1439 = vmatpush2.bf16.msra.mxu0 %v5066_v27  ;;  %v5153_v27 = vld [vmem:[#allocation9 + $0x568] ss:$16 sps:$4 sm:$0xff]  }
  0xa4   :  { %1517 = vmatpush2.bf16.msra.mxu1 %v5063_v25  ;;  %1531 = vmatprep.subr.bf16.mxu0 %v5074_v30  ;;  %v5158_v25 = vld [vmem:[#allocation9 + $0x32c] ss:$16 sps:$4 sm:$0xff]  }
  0xa5   :  { %1518 = vmatprep.subr.bf16.mxu1 %v5071_v28  ;;  %v5156_v28 = vld [vmem:[#allocation9 + $0x328] ss:$16 sps:$4 sm:$0xff]   ;;  %v5161_v30 = vld [vmem:[#allocation9 + $0x54c] ss:$16 sps:$4 sm:$0xff]  }
  0xa6   :  { %1441 = vmatmul.mubr.bf16.vlgmr.msra.gmra.mxu0 %v5860_v32 }
  0xa7   :  { %1532 = vmatpush1.bf16.msra.mxu0 %v5072_v34  ;;  %1563 = vmatprep.mubr.bf16.mxu0 %v5833_v3  ;;  %v5093_v3 = vld [vmem:[#allocation9 + $0x4a8] ss:$16 sps:$4 sm:$0xff]  }
  0xa8   :  { %1519 = vmatpush2.bf16.msra.mxu1 %v5069_v33  ;;  %1533 = vmatprep.subr.bf16.mxu0 %v5080_v36  ;;  %v5164_v33 = vld [vmem:[#allocation9 + $0x30c] ss:$16 sps:$4 sm:$0xff]   ;;  %v5159_v34 = vld [vmem:[#allocation9 + $0x548] ss:$16 sps:$4 sm:$0xff]  }
  0xa9   :  { %1520 = vmatprep.subr.bf16.mxu1 %v5077_v35  ;;  %v5162_v35 = vld [vmem:[#allocation9 + $0x308] ss:$16 sps:$4 sm:$0xff]   ;;  %v5167_v36 = vld [vmem:[#allocation9 + $0x52c] ss:$16 sps:$4 sm:$0xff]  }
  0xab   :  { %1534 = vmatpush1.bf16.msra.mxu0 %v5078_v38  ;;  %v5165_v38 = vld [vmem:[#allocation9 + $0x528] ss:$16 sps:$4 sm:$0xff]  }
  0xac   :  { %1521 = vmatpush2.bf16.msra.mxu1 %v5075_v37  ;;  %1535 = vmatprep.subr.bf16.mxu0 %v5086_v40  ;;  %v5170_v37 = vld [vmem:[#allocation9 + $0x60c] ss:$16 sps:$4 sm:$0xff]  }
  0xad   :  { %1572 = vmatprep.subr.bf16.mxu1 %v5083_v39  ;;  %v5168_v39 = vld [vmem:[#allocation9 + $0x608] ss:$16 sps:$4 sm:$0xff]   ;;  %v5173_v40 = vld [vmem:[#allocation9 + $0x50c] ss:$16 sps:$4 sm:$0xff]  }
  0xaf   :  { %1523 = vmatmul.mubr.bf16.vlgmr.msra.gmra.mxu1 %v5842_v19  ;;  %1536 = vmatpush1.bf16.msra.mxu0 %v5084_v41  ;;  %v5099_v19 = vld [vmem:[#allocation9 + $0x488] ss:$16 sps:$4 sm:$0xff]  }
  0xb0   :  { %1573 = vmatpush1.bf16.msra.mxu1 %v5081_v13  ;;  %1537 = vmatprep.subr.bf16.mxu0 %v5092_v44  ;;  %v5171_v13 = vld [vmem:[#allocation9 + $0x508] ss:$16 sps:$4 sm:$0xff]  }
  0xb1   :  { %1574 = vmatprep.subr.bf16.mxu1 %v5089_v42  ;;  %1604 = vmatprep.mubr.bf16.mxu1 %v5846_v26  ;;  %v5108_v26 = vld [vmem:[#allocation9 + $0x228] ss:$16 sps:$4 sm:$0xff]  }
  0xb3   :  { %1538 = vmatpush1.bf16.msra.mxu0 %v5090_v46 }
  0xb4   :  { %1575 = vmatpush1.bf16.msra.mxu1 %v5087_v45  ;;  %1539 = vmatprep.subr.bf16.mxu0 %v5098_v48 }
  0xb5   :  { %1576 = vmatprep.subr.bf16.mxu1 %v5095_v47 }
  0xb7   :  { %1540 = vmatpush1.bf16.msra.mxu0 %v5096_v49 }
  0xb8   :  { %1577 = vmatpush1.bf16.msra.mxu1 %v5093_v3  ;;  %1541 = vmatprep.subr.bf16.mxu0 %v5104_v51 }
  0xb9   :  { %1578 = vmatprep.subr.bf16.mxu1 %v5101_v50 }
  0xbb   :  { %1542 = vmatpush1.bf16.msra.mxu0 %v5102_v52 }
  0xbc   :  { %1579 = vmatpush1.bf16.msra.mxu1 %v5099_v19  ;;  %1543 = vmatprep.subr.bf16.mxu0 %v5110_v54 }
  0xbd   :  { %1580 = vmatprep.subr.bf16.mxu1 %v5107_v53 }
  0xbf   :  { %1544 = vmatpush1.bf16.msra.mxu0 %v5108_v26 }
  0xc0   :  { %1581 = vmatpush1.bf16.msra.mxu1 %v5105_v55  ;;  %1545 = vmatprep.subr.bf16.mxu0 %v5116_v57 }
  0xc1   :  { %1582 = vmatprep.subr.bf16.mxu1 %v5113_v56 }
  0xc3   :  { %1546 = vmatpush1.bf16.msra.mxu0 %v5114_v59 }
  0xc4   :  { %1583 = vmatpush1.bf16.msra.mxu1 %v5111_v58  ;;  %1547 = vmatprep.subr.bf16.mxu0 %v5122_v61 }
  0xc5   :  { %1584 = vmatprep.subr.bf16.mxu1 %v5119_v60 }
  0xc7   :  { %1548 = vmatpush2.bf16.msra.mxu0 %v5120_v63 }
  0xc8   :  { %1585 = vmatpush1.bf16.msra.mxu1 %v5117_v62  ;;  %1549 = vmatprep.subr.bf16.mxu0 %v5128_v1 }
  0xc9   :  { %1586 = vmatprep.subr.bf16.mxu1 %v5125_v0 }
  0xcb   :  { %1550 = vmatpush2.bf16.msra.mxu0 %v5126_v4 }
  0xcc   :  { %1587 = vmatpush1.bf16.msra.mxu1 %v5123_v2  ;;  %1551 = vmatprep.subr.bf16.mxu0 %v5134_v6 }
  0xcd   :  { %1588 = vmatprep.subr.bf16.mxu1 %v5131_v5 }
  0xcf   :  { %1552 = vmatpush2.bf16.msra.mxu0 %v5132_v8 }
  0xd0   :  { %1589 = vmatpush2.bf16.msra.mxu1 %v5129_v7  ;;  %1553 = vmatprep.subr.bf16.mxu0 %v5140_v10 }
  0xd1   :  { %1590 = vmatprep.subr.bf16.mxu1 %v5137_v9 }
  0xd3   :  { %1554 = vmatpush2.bf16.msra.mxu0 %v5138_v12 }
  0xd4   :  { %1591 = vmatpush2.bf16.msra.mxu1 %v5135_v11  ;;  %1555 = vmatprep.subr.bf16.mxu0 %v5146_v15 }
  0xd5   :  { %1592 = vmatprep.subr.bf16.mxu1 %v5143_v14 }
  0xd7   :  { %1556 = vmatpush2.bf16.msra.mxu0 %v5144_v17 }
  0xd8   :  { %1593 = vmatpush2.bf16.msra.mxu1 %v5141_v16  ;;  %1557 = vmatprep.subr.bf16.mxu0 %v5152_v21 }
  0xd9   :  { %1594 = vmatprep.subr.bf16.mxu1 %v5149_v18 }
  0xdb   :  { %1558 = vmatpush2.bf16.msra.mxu0 %v5150_v23 }
  0xdc   :  { %1595 = vmatpush2.bf16.msra.mxu1 %v5147_v22  ;;  %1559 = vmatprep.subr.bf16.mxu0 %v5158_v25 }
  0xdd   :  { %1596 = vmatprep.subr.bf16.mxu1 %v5155_v24 }
  0xdf   :  { %1560 = vmatpush2.bf16.msra.mxu0 %v5156_v28 }
  0xe0   :  { %1597 = vmatpush2.bf16.msra.mxu1 %v5153_v27  ;;  %1561 = vmatprep.subr.bf16.mxu0 %v5164_v33 }
  0xe1   :  { %1598 = vmatprep.subr.bf16.mxu1 %v5161_v30 }
  0xe3   :  { %1562 = vmatpush2.bf16.msra.mxu0 %v5162_v35 }
  0xe4   :  { %1599 = vmatpush2.bf16.msra.mxu1 %v5159_v34  ;;  %1627 = vmatprep.subr.bf16.mxu0 %v5170_v37 }
  0xe5   :  { %1600 = vmatprep.subr.bf16.mxu1 %v5167_v36 }
  0xe6   :  { %1564 = vmatmul.mubr.bf16.vlgmr.msra.gmra.mxu0 %v5844_v20 }
  0xe7   :  { %1628 = vmatpush1.bf16.msra.mxu0 %v5168_v39  ;;  %1645 = vmatprep.mubr.bf16.mxu0 %v5774_v29 }
  0xe8   :  { %1601 = vmatpush2.bf16.msra.mxu1 %v5165_v38 }
  0xe9   :  { %1602 = vmatprep.subr.bf16.mxu1 %v5173_v40 }
  0xec   :  { %1603 = vmatpush2.bf16.msra.mxu1 %v5171_v13 }
  0xee   :  { %4530 = vmatmul.mubr.msk.bf16.vlgmr.msra.gmra.mxu0 %vm1322_vm0, %v5853_v31 }
  0xef   :  { %1605 = vmatmul.mubr.bf16.vlgmr.msra.gmra.mxu1 %v5860_v32 }
 0x126   :  { %v1360_v41 = vpop.f32.mrf.mxu0 }
 0x127   :  { %v1401_v42 = vpop.f32.mrf.mxu1 }
 0x128   :  { %v1402_v44 = vadd.f32 %v1401_v42, %v1360_v41  ;;  %v1362_v45 = vpop.f32.mrf.mxu0 }
 0x129   :  { %v1403_v46 = vpop.f32.mrf.mxu1 }
 0x12a   :  { %v1404_v47 = vadd.f32 %v1403_v46, %v1362_v45  ;;  %v1364_v48 = vpop.f32.mrf.mxu0 }
 0x12b   :  { %v1405_v20 = vpop.f32.mrf.mxu1 }
 0x12c   :  { %v1365_v3 = vpop.f32.mrf.mxu0 }
 0x12d   :  { %v1406_v49 = vpop.f32.mrf.mxu1 }
 0x12f   :  { %v1483_v50 = vpop.f32.mrf.mxu1 }
 0x131   :  { %v1485_v51 = vpop.f32.mrf.mxu1 }
 0x133   :  { %v1487_v19 = vpop.f32.mrf.mxu1 }
 0x135   :  { %v1488_v29 = vpop.f32.mrf.mxu1 }
 0x166   :  { %v1442_v52 = vpop.f32.mrf.mxu0 }
 0x167   :  { %v1443_v53 = vadd.f32 %v1442_v52, %v1402_v44 }
 0x168   :  { %v1444_v32 = vpop.f32.mrf.mxu0 }
 0x169   :  { %v1484_v54 = vadd.f32 %v1483_v50, %v1443_v53  ;;  %v1445_v31 = vadd.f32 %v1444_v32, %v1404_v47 }
 0x16a   :  { %v1446_v55 = vpop.f32.mrf.mxu0 }
 0x16b   :  { %v1655_v26 = vsel %vm1654_vm1, %v1484_v54, 0.0  ;;  %v1486_v56 = vadd.f32 %v1485_v51, %v1445_v31 }
 0x16c   :  { %v1656_v57 = vrot.slane %v1655_v26, 4  ;;  %v1447_v58 = vpop.f32.mrf.mxu0 }
 0x16d   :  { %v1662_v59 = vsel %vm1654_vm1, %v1486_v56, 0.0 }
 0x16e   :  { %5695 = shalt.err (!%p5692_p5)  }
 0x16f   :  { %66 = dma.hbm_to_vmem [thread:$0]  %s6056_s2, 16384, %s64_s5, [#allocation5]  ;;  %v1657_v60 = vadd.f32 %v1656_v57, %v1655_v26  ;;  %v1663_v61 = vrot.slane %v1662_v59, 4  ;;  %v5876_v62 = vpop.f32.mrf.mxu1 }
 0x170   :  { %s5704_s18 = scalar_lea.vmem %s76_s14, 16384  ;;  %p5709_p7 = scmp.lt.s32.totalorder %s76_s14, %s76_s14 }
 0x171   :  { %p5705_p6 = scmp.ne.s32.totalorder %s76_s14, %s5704_s18  ;;  %p5710_p8 = scmp.lt.s32.totalorder %s5704_s18, %s5704_s18 }
 0x173   :  { %p5711_p9 = por %p5710_p8, %p5709_p7 }
 0x175   :  { %p5712_p10 = pnand %p5711_p9, %p5705_p6 }
 0x177   :  { %5715 = shalt.err (!%p5712_p10)  }
 0x178   :  { %78 = dma.hbm_to_vmem [thread:$0]  %s6057_s3, 16384, %s76_s14, [#allocation5 + $0x1]  ;;  %v1658_v63 = vrot.slane %v1657_v60, 2  ;;  %v1664_v0 = vadd.f32 %v1663_v61, %v1662_v59  ;;  %v5881_v1 = vpop.f32.mrf.mxu1 }
 0x179   :  { %s5777_s2 = smov [#allocation4]  }
 0x17a   :  { %s87_s21 = sshll.u32 %s5777_s2, 4  ;;  %v1659_v2 = vadd.f32 %v1658_v63, %v1657_v60  ;;  %v1665_v4 = vrot.slane %v1664_v0, 2  ;;  %v1528_v5 = vpop.f32.mrf.mxu1  ;;  %s88_s21 = int_to_ptr.vmem [resolvable:$true] %s87_s21 }
 0x17b   :  { %s5724_s22 = scalar_lea.vmem %s88_s21, 4096  ;;  %p5729_p12 = scmp.lt.s32.totalorder %s88_s21, %s88_s21 }
 0x17c   :  { %p5725_p11 = scmp.ne.s32.totalorder %s88_s21, %s5724_s22  ;;  %p5730_p13 = scmp.lt.s32.totalorder %s5724_s22, %s5724_s22 }
 0x17e   :  { %p5731_p0 = por %p5730_p13, %p5729_p12 }
 0x180   :  { %p5732_p1 = pnand %p5731_p0, %p5725_p11 }
 0x182   :  { %5735 = shalt.err (!%p5732_p1)  }
 0x183   :  { %90 = dma.hbm_to_vmem [thread:$0]  %s6058_s4, 4096, %s88_s21, [#allocation5 + $0x2]  ;;  %v1660_v6 = vrot.slane %v1659_v2, 1  ;;  %v1666_v7 = vadd.f32 %v1665_v4, %v1664_v0  ;;  %v1529_v8 = vpop.f32.mrf.mxu1  ;;  %v5889_v42 = vsub.s32 0, %v5824_v43  ;;  %v5891_v44 = vld [vmem:[#allocation11] sm:$0xff]  ;;  %v5894_v45 = vsub.s32 1, %v5824_v43 }
 0x184   :  { %v5896_v46 = vld [vmem:[#allocation11 + $0x8] sm:$0xff] }
 0x185   :  { %v1661_v9 = vadd.f32 %v1660_v6, %v1659_v2  ;;  %v1667_v10 = vrot.slane %v1666_v7, 1  ;;  %v1743_v47 = vrot.slane %v5891_v44, %v5889_v42  ;;  %v1763_v3 = vrot.slane %v5891_v44, %v5894_v45 }
 0x186   :  { %v1747_v49 = vrot.slane %v5896_v46, %v5889_v42  ;;  %v1767_v29 = vrot.slane %v5896_v46, %v5894_v45 }
 0x187   :  { %v1684_v11 = vmul.f32 0.5, %v1661_v9  ;;  %v1668_v12 = vadd.f32 %v1667_v10, %v1666_v7 }
 0x189   :  { %v1688_v14 = vsub.f32 %v1484_v54, %v1684_v11  ;;  %v1685_v15 = vmul.f32 0.5, %v1668_v12  ;;  %v5778_v54 = vmov -1.0  }
 0x18b   :  { %v1692_v16 = vmul.f32 %v1688_v14, %v1688_v14  ;;  %v1689_v17 = vsub.f32 %v1486_v56, %v1685_v15 }
 0x18d   :  { %v1696_v18 = vsel %vm1654_vm1, %v1692_v16, 0.0  ;;  %v1693_v21 = vmul.f32 %v1689_v17, %v1689_v17 }
 0x18e   :  { %v1697_v22 = vrot.slane %v1696_v18, 4 }
 0x18f   :  { %v1703_v23 = vsel %vm1654_vm1, %v1693_v21, 0.0 }
 0x190   :  { %v1698_v24 = vadd.f32 %v1697_v22, %v1696_v18  ;;  %v1704_v25 = vrot.slane %v1703_v23, 4 }
 0x192   :  { %v1699_v27 = vrot.slane %v1698_v24, 2  ;;  %v1705_v28 = vadd.f32 %v1704_v25, %v1703_v23 }
 0x194   :  { %v1700_v30 = vadd.f32 %v1699_v27, %v1698_v24  ;;  %v1706_v33 = vrot.slane %v1705_v28, 2 }
 0x196   :  { %v1701_v34 = vrot.slane %v1700_v30, 1  ;;  %v1707_v35 = vadd.f32 %v1706_v33, %v1705_v28 }
 0x198   :  { %v1702_v36 = vadd.f32 %v1701_v34, %v1700_v30  ;;  %v1708_v37 = vrot.slane %v1707_v35, 1 }
 0x19a   :  { %v1724_v38 = vmul.f32 0.5, %v1702_v36  ;;  %v1709_v39 = vadd.f32 %v1708_v37, %v1707_v35 }
 0x19c   :  { %v1728_v40 = vadd.f32 1e-05, %v1724_v38  ;;  %v1725_v13 = vmul.f32 0.5, %v1709_v39 }
 0x19e   :  { %5174 = vrsqrt.f32 %v1728_v40  ;;  %v1729_v41 = vadd.f32 1e-05, %v1725_v13 }
 0x1a0   :  { %5176 = vrsqrt.f32 %v1729_v41 }
 0x1a6   :  { %v1565_v56 = vpop.f32.mrf.mxu0 }
 0x1a7   :  { %v1566_v61 = vadd.f32 %v1565_v56, %v5876_v62  ;;  %v5918_v56 = vld [vmem:[#allocation11 + $0x10] sm:$0xff] }
 0x1a8   :  { %v1567_v58 = vpop.f32.mrf.mxu0 }
 0x1a9   :  { %v1568_v2 = vadd.f32 %v1567_v58, %v5881_v1  ;;  %v5920_v58 = vld [vmem:[#allocation11 + $0x18] sm:$0xff] }
 0x1aa   :  { %v1569_v59 = vpop.f32.mrf.mxu0 }
 0x1ab   :  { %v5175_v48 = vpop.eup %5174  ;;  %v1751_v59 = vrot.slane %v5918_v56, %v5889_v42 }
 0x1ac   :  { %v1736_v20 = vmul.f32 %v5175_v48, %v1688_v14  ;;  %v1570_v60 = vpop.f32.mrf.mxu0 }
 0x1ad   :  { %v5177_v50 = vpop.eup %5176 }
 0x1ae   :  { %v1756_v51 = vmul.f32 %v1743_v47, %v1736_v20  ;;  %v1737_v19 = vmul.f32 %v5177_v50, %v1689_v17  ;;  %v1647_v0 = vpop.f32.mrf.mxu0 }
 0x1af   :  { %v1606_v63 = vpop.f32.mrf.mxu1 }
 0x1b0   :  { %v1776_v52 = vadd.f32 %v1763_v3, %v1756_v51  ;;  %v1757_v53 = vmul.f32 %v1747_v49, %v1737_v19  ;;  %v1607_v4 = vadd.f32 %v1606_v63, %v1566_v61  ;;  %v1649_v6 = vpop.f32.mrf.mxu0  ;;  %v1771_v63 = vrot.slane %v5918_v56, %v5894_v45 }
 0x1b1   :  { %v1608_v5 = vpop.f32.mrf.mxu1 }
 0x1b2   :  { %vm1780_vm2 = vcmp.ge.f32.partialorder %v1776_v52, 0.0  ;;  %v1777_v32 = vadd.f32 %v1767_v29, %v1757_v53  ;;  %v1648_v7 = vadd.f32 %v1647_v0, %v1607_v4  ;;  %v1609_v8 = vadd.f32 %v1608_v5, %v1568_v2  ;;  %v1651_v10 = vpop.f32.mrf.mxu0 }
 0x1b3   :  { %v1784_v31 = vsel %vm1780_vm2, 1.0, %v5778_v54  ;;  %v1610_v9 = vpop.f32.mrf.mxu1  ;;  %v1755_v0 = vrot.slane %v5920_v58, %v5889_v42 }
 0x1b4   :  { %v5907_v55 = vpack.c.bf16 %v1784_v31, %v1784_v31  ;;  %vm1781_vm3 = vcmp.ge.f32.partialorder %v1777_v32, 0.0  ;;  %v1669_v11 = vsel %vm1654_vm1, %v1648_v7, 0.0  ;;  %v1650_v12 = vadd.f32 %v1649_v6, %v1609_v8  ;;  %v1652_v16 = vpop.f32.mrf.mxu0 }
 0x1b5   :  { %v1785_v26 = vsel %vm1781_vm3, 1.0, %v5778_v54  ;;  %v1670_v14 = vrot.slane %v1669_v11, 4  ;;  %v1611_v15 = vpop.f32.mrf.mxu1  ;;  %v1775_v6 = vrot.slane %v5920_v58, %v5894_v45 }
 0x1b6   :  { %v5910_v57 = vpack.c.bf16 %v1785_v26, %v1785_v26  ;;  %v1676_v17 = vsel %vm1654_vm1, %v1650_v12, 0.0 }
 0x1b7   :  { %v1671_v62 = vadd.f32 %v1670_v14, %v1669_v11  ;;  %v1677_v18 = vrot.slane %v1676_v17, 4 }
 0x1b9   :  { %v1672_v21 = vrot.slane %v1671_v62, 2  ;;  %v1678_v22 = vadd.f32 %v1677_v18, %v1676_v17 }
 0x1bb   :  { %v1673_v1 = vadd.f32 %v1672_v21, %v1671_v62  ;;  %v1679_v23 = vrot.slane %v1678_v22, 2 }
 0x1bd   :  { %v1674_v24 = vrot.slane %v1673_v1, 1  ;;  %v1680_v25 = vadd.f32 %v1679_v23, %v1678_v22 }
 0x1bf   :  { %v1675_v27 = vadd.f32 %v1674_v24, %v1673_v1  ;;  %v1681_v28 = vrot.slane %v1680_v25, 1 }
 0x1c1   :  { %v1686_v30 = vmul.f32 0.5, %v1675_v27  ;;  %v1682_v33 = vadd.f32 %v1681_v28, %v1680_v25 }
 0x1c3   :  { %v1690_v34 = vsub.f32 %v1648_v7, %v1686_v30  ;;  %v1687_v35 = vmul.f32 0.5, %v1682_v33 }
 0x1c5   :  { %v1694_v36 = vmul.f32 %v1690_v34, %v1690_v34  ;;  %v1691_v37 = vsub.f32 %v1650_v12, %v1687_v35 }
 0x1c7   :  { %v1710_v38 = vsel %vm1654_vm1, %v1694_v36, 0.0  ;;  %v1695_v39 = vmul.f32 %v1691_v37, %v1691_v37 }
 0x1c8   :  { %v1711_v40 = vrot.slane %v1710_v38, 4 }
 0x1c9   :  { %v1717_v13 = vsel %vm1654_vm1, %v1695_v39, 0.0 }
 0x1ca   :  { %v1712_v41 = vadd.f32 %v1711_v40, %v1710_v38  ;;  %v1718_v47 = vrot.slane %v1717_v13, 4 }
 0x1cc   :  { %v1713_v48 = vrot.slane %v1712_v41, 2  ;;  %v1719_v20 = vadd.f32 %v1718_v47, %v1717_v13 }
 0x1ce   :  { %v1714_v3 = vadd.f32 %v1713_v48, %v1712_v41  ;;  %v1720_v49 = vrot.slane %v1719_v20, 2 }
 0x1d0   :  { %v1715_v50 = vrot.slane %v1714_v3, 1  ;;  %v1721_v51 = vadd.f32 %v1720_v49, %v1719_v20 }
 0x1d2   :  { %v1716_v19 = vadd.f32 %v1715_v50, %v1714_v3  ;;  %v1722_v29 = vrot.slane %v1721_v51, 1 }
 0x1d4   :  { %v1726_v52 = vmul.f32 0.5, %v1716_v19  ;;  %v1723_v53 = vadd.f32 %v1722_v29, %v1721_v51 }
 0x1d6   :  { %v1730_v32 = vadd.f32 1e-05, %v1726_v52  ;;  %v1727_v31 = vmul.f32 0.5, %v1723_v53 }
 0x1d8   :  { %5178 = vrsqrt.f32 %v1730_v32  ;;  %v1731_v26 = vadd.f32 1e-05, %v1727_v31 }
 0x1da   :  { %5180 = vrsqrt.f32 %v1731_v26 }
 0x1e5   :  { %v5179_v60 = vpop.eup %5178 }
 0x1e6   :  { %v1738_v61 = vmul.f32 %v5179_v60, %v1690_v34 }
 0x1e7   :  { %v5181_v2 = vpop.eup %5180 }
 0x1e8   :  { %v1758_v4 = vmul.f32 %v1751_v59, %v1738_v61  ;;  %v1739_v5 = vmul.f32 %v5181_v2, %v1691_v37 }
 0x1ea   :  { %v1778_v7 = vadd.f32 %v1771_v63, %v1758_v4  ;;  %v1759_v8 = vmul.f32 %v1755_v0, %v1739_v5 }
 0x1ec   :  { %vm1782_vm4 = vcmp.ge.f32.partialorder %v1778_v7, 0.0  ;;  %v1779_v9 = vadd.f32 %v1775_v6, %v1759_v8 }
 0x1ed   :  { %v1786_v10 = vsel %vm1782_vm4, 1.0, %v5778_v54 }
 0x1ee   :  { %v5931_v11 = vpack.c.bf16 %v1786_v10, %v1786_v10  ;;  %vm1783_vm5 = vcmp.ge.f32.partialorder %v1779_v9, 0.0 }
 0x1ef   :  { %v1787_v12 = vsel %vm1783_vm5, 1.0, %v5778_v54 }
 0x1f0   :  { %v5934_v14 = vpack.c.bf16 %v1787_v12, %v1787_v12 }
 0x1f1   :  { %5760 = dma.done.wait [#allocation5], 16384 }
 0x1f2   :  { %5761 = vsyncadd [#allocation5], 4294950912  ;;  %2596 = vmatprep.mubr.bf16.mxu0 %v5910_v57  ;;  %2637 = vmatprep.mubr.bf16.mxu1 %v5934_v14  ;;  %v5182_v42 = vld [vmem:[#allocation2 + $0xe4] ss:$16 sps:$4 sm:$0xff]   ;;  %v5186_v15 = vld [vmem:[#allocation2 + $0xe0] ss:$16 sps:$4 sm:$0xff]  }
 0x1f3   :  { %v5184_v45 = vld [vmem:[#allocation2 + $0x2e4] ss:$16 sps:$4 sm:$0xff]   ;;  %2564 = vmatprep.subr.bf16.mxu0 %v5182_v42  ;;  %v5187_v16 = vld [vmem:[#allocation2 + $0x2e0] ss:$16 sps:$4 sm:$0xff]  }
 0x1f4   :  { %2605 = vmatprep.subr.bf16.mxu1 %v5184_v45  ;;  %v5188_v17 = vld [vmem:[#allocation2 + $0xc4] ss:$16 sps:$4 sm:$0xff]   ;;  %2565 = vmatpush1.bf16.msra.mxu0 %v5186_v15  ;;  %v5192_v18 = vld [vmem:[#allocation2 + $0xc0] ss:$16 sps:$4 sm:$0xff]  }
 0x1f5   :  { %2606 = vmatpush1.bf16.msra.mxu1 %v5187_v16  ;;  %v5190_v62 = vld [vmem:[#allocation2 + $0x2c4] ss:$16 sps:$4 sm:$0xff]   ;;  %2566 = vmatprep.subr.bf16.mxu0 %v5188_v17  ;;  %v5193_v21 = vld [vmem:[#allocation2 + $0x2c0] ss:$16 sps:$4 sm:$0xff]  }
 0x1f6   :  { %2607 = vmatprep.subr.bf16.mxu1 %v5190_v62  ;;  %v5194_v22 = vld [vmem:[#allocation2 + $0xa4] ss:$16 sps:$4 sm:$0xff]   ;;  %v5198_v23 = vld [vmem:[#allocation2 + $0xa0] ss:$16 sps:$4 sm:$0xff]  }
 0x1f7   :  { %v5196_v1 = vld [vmem:[#allocation2 + $0x2a4] ss:$16 sps:$4 sm:$0xff]   ;;  %v5199_v24 = vld [vmem:[#allocation2 + $0x2a0] ss:$16 sps:$4 sm:$0xff]  }
 0x1f8   :  { %2567 = vmatpush1.bf16.msra.mxu0 %v5192_v18  ;;  %v5200_v25 = vld [vmem:[#allocation2 + $0x84] ss:$16 sps:$4 sm:$0xff]   ;;  %v5204_v28 = vld [vmem:[#allocation2 + $0x80] ss:$16 sps:$4 sm:$0xff]  }
 0x1f9   :  { %2608 = vmatpush1.bf16.msra.mxu1 %v5193_v21  ;;  %2568 = vmatprep.subr.bf16.mxu0 %v5194_v22  ;;  %v5202_v27 = vld [vmem:[#allocation2 + $0x284] ss:$16 sps:$4 sm:$0xff]   ;;  %v5205_v30 = vld [vmem:[#allocation2 + $0x280] ss:$16 sps:$4 sm:$0xff]  }
 0x1fa   :  { %2609 = vmatprep.subr.bf16.mxu1 %v5196_v1  ;;  %v5206_v33 = vld [vmem:[#allocation2 + $0x64] ss:$16 sps:$4 sm:$0xff]   ;;  %v5210_v35 = vld [vmem:[#allocation2 + $0x60] ss:$16 sps:$4 sm:$0xff]  }
 0x1fb   :  { %v5208_v34 = vld [vmem:[#allocation2 + $0x264] ss:$16 sps:$4 sm:$0xff]   ;;  %v5211_v36 = vld [vmem:[#allocation2 + $0x260] ss:$16 sps:$4 sm:$0xff]  }
 0x1fc   :  { %2569 = vmatpush1.bf16.msra.mxu0 %v5198_v23  ;;  %v5212_v37 = vld [vmem:[#allocation2 + $0x44] ss:$16 sps:$4 sm:$0xff]   ;;  %v5216_v39 = vld [vmem:[#allocation2 + $0x40] ss:$16 sps:$4 sm:$0xff]   ;;  %v5280_v23 = vld [vmem:[#allocation2 + $0xec] ss:$16 sps:$4 sm:$0xff]  }
 0x1fd   :  { %2610 = vmatpush1.bf16.msra.mxu1 %v5199_v24  ;;  %2570 = vmatprep.subr.bf16.mxu0 %v5200_v25  ;;  %v5214_v38 = vld [vmem:[#allocation2 + $0x244] ss:$16 sps:$4 sm:$0xff]   ;;  %v5217_v40 = vld [vmem:[#allocation2 + $0x240] ss:$16 sps:$4 sm:$0xff]   ;;  %v5283_v24 = vld [vmem:[#allocation2 + $0x2ec] ss:$16 sps:$4 sm:$0xff]  }
 0x1fe   :  { %2611 = vmatprep.subr.bf16.mxu1 %v5202_v27  ;;  %v5218_v13 = vld [vmem:[#allocation2 + $0x24] ss:$16 sps:$4 sm:$0xff]   ;;  %v5222_v47 = vld [vmem:[#allocation2 + $0x20] ss:$16 sps:$4 sm:$0xff]   ;;  %v5278_v25 = vld [vmem:[#allocation2 + $0xe8] ss:$16 sps:$4 sm:$0xff]  }
 0x1ff   :  { %v5220_v41 = vld [vmem:[#allocation2 + $0x224] ss:$16 sps:$4 sm:$0xff]   ;;  %v5223_v48 = vld [vmem:[#allocation2 + $0x220] ss:$16 sps:$4 sm:$0xff]   ;;  %v5281_v27 = vld [vmem:[#allocation2 + $0x2e8] ss:$16 sps:$4 sm:$0xff]  }
 0x200   :  { %2571 = vmatpush1.bf16.msra.mxu0 %v5204_v28  ;;  %v5224_v20 = vld [vmem:[#allocation2 + $0x4] ss:$16 sps:$4 sm:$0xff]   ;;  %v5228_v49 = vld [vmem:[#allocation2] ss:$16 sps:$4 sm:$0xff]   ;;  %v5286_v28 = vld [vmem:[#allocation2 + $0xcc] ss:$16 sps:$4 sm:$0xff]  }
 0x201   :  { %2612 = vmatpush1.bf16.msra.mxu1 %v5205_v30  ;;  %2572 = vmatprep.subr.bf16.mxu0 %v5206_v33  ;;  %v5226_v3 = vld [vmem:[#allocation2 + $0x204] ss:$16 sps:$4 sm:$0xff]   ;;  %v5229_v50 = vld [vmem:[#allocation2 + $0x200] ss:$16 sps:$4 sm:$0xff]   ;;  %v5289_v30 = vld [vmem:[#allocation2 + $0x2cc] ss:$16 sps:$4 sm:$0xff]  }
 0x202   :  { %2613 = vmatprep.subr.bf16.mxu1 %v5208_v34  ;;  %v5230_v51 = vld [vmem:[#allocation2 + $0x1e4] ss:$16 sps:$4 sm:$0xff]   ;;  %v5234_v29 = vld [vmem:[#allocation2 + $0x1e0] ss:$16 sps:$4 sm:$0xff]   ;;  %v5284_v33 = vld [vmem:[#allocation2 + $0xc8] ss:$16 sps:$4 sm:$0xff]  }
 0x203   :  { %v5232_v19 = vld [vmem:[#allocation2 + $0x3e4] ss:$16 sps:$4 sm:$0xff]   ;;  %v5235_v52 = vld [vmem:[#allocation2 + $0x3e0] ss:$16 sps:$4 sm:$0xff]   ;;  %v5287_v34 = vld [vmem:[#allocation2 + $0x2c8] ss:$16 sps:$4 sm:$0xff]  }
 0x204   :  { %2573 = vmatpush1.bf16.msra.mxu0 %v5210_v35  ;;  %v5236_v53 = vld [vmem:[#allocation2 + $0x1c4] ss:$16 sps:$4 sm:$0xff]   ;;  %v5240_v31 = vld [vmem:[#allocation2 + $0x1c0] ss:$16 sps:$4 sm:$0xff]   ;;  %v5292_v35 = vld [vmem:[#allocation2 + $0xac] ss:$16 sps:$4 sm:$0xff]  }
 0x205   :  { %2614 = vmatpush1.bf16.msra.mxu1 %v5211_v36  ;;  %2574 = vmatprep.subr.bf16.mxu0 %v5212_v37  ;;  %v5238_v32 = vld [vmem:[#allocation2 + $0x3c4] ss:$16 sps:$4 sm:$0xff]   ;;  %v5241_v26 = vld [vmem:[#allocation2 + $0x3c0] ss:$16 sps:$4 sm:$0xff]   ;;  %v5295_v36 = vld [vmem:[#allocation2 + $0x2ac] ss:$16 sps:$4 sm:$0xff]  }
 0x206   :  { %2615 = vmatprep.subr.bf16.mxu1 %v5214_v38  ;;  %v5242_v59 = vld [vmem:[#allocation2 + $0x1a4] ss:$16 sps:$4 sm:$0xff]   ;;  %v5246_v61 = vld [vmem:[#allocation2 + $0x1a0] ss:$16 sps:$4 sm:$0xff]   ;;  %v5290_v37 = vld [vmem:[#allocation2 + $0xa8] ss:$16 sps:$4 sm:$0xff]  }
 0x207   :  { %v5244_v60 = vld [vmem:[#allocation2 + $0x3a4] ss:$16 sps:$4 sm:$0xff]   ;;  %v5247_v63 = vld [vmem:[#allocation2 + $0x3a0] ss:$16 sps:$4 sm:$0xff]   ;;  %v5293_v38 = vld [vmem:[#allocation2 + $0x2a8] ss:$16 sps:$4 sm:$0xff]  }
 0x208   :  { %2575 = vmatpush1.bf16.msra.mxu0 %v5216_v39  ;;  %v5248_v0 = vld [vmem:[#allocation2 + $0x184] ss:$16 sps:$4 sm:$0xff]   ;;  %v5252_v4 = vld [vmem:[#allocation2 + $0x180] ss:$16 sps:$4 sm:$0xff]   ;;  %v5298_v39 = vld [vmem:[#allocation2 + $0x8c] ss:$16 sps:$4 sm:$0xff]  }
 0x209   :  { %2616 = vmatpush1.bf16.msra.mxu1 %v5217_v40  ;;  %2576 = vmatprep.subr.bf16.mxu0 %v5218_v13  ;;  %v5250_v2 = vld [vmem:[#allocation2 + $0x384] ss:$16 sps:$4 sm:$0xff]   ;;  %v5253_v5 = vld [vmem:[#allocation2 + $0x380] ss:$16 sps:$4 sm:$0xff]   ;;  %v5301_v40 = vld [vmem:[#allocation2 + $0x28c] ss:$16 sps:$4 sm:$0xff]  }
 0x20a   :  { %2617 = vmatprep.subr.bf16.mxu1 %v5220_v41  ;;  %v5254_v6 = vld [vmem:[#allocation2 + $0x164] ss:$16 sps:$4 sm:$0xff]   ;;  %v5258_v8 = vld [vmem:[#allocation2 + $0x160] ss:$16 sps:$4 sm:$0xff]   ;;  %v5296_v13 = vld [vmem:[#allocation2 + $0x88] ss:$16 sps:$4 sm:$0xff]  }
 0x20b   :  { %v5256_v7 = vld [vmem:[#allocation2 + $0x364] ss:$16 sps:$4 sm:$0xff]   ;;  %v5259_v9 = vld [vmem:[#allocation2 + $0x360] ss:$16 sps:$4 sm:$0xff]   ;;  %v5299_v41 = vld [vmem:[#allocation2 + $0x288] ss:$16 sps:$4 sm:$0xff]  }
 0x20c   :  { %2577 = vmatpush1.bf16.msra.mxu0 %v5222_v47  ;;  %v5260_v10 = vld [vmem:[#allocation2 + $0x144] ss:$16 sps:$4 sm:$0xff]   ;;  %v5264_v42 = vld [vmem:[#allocation2 + $0x140] ss:$16 sps:$4 sm:$0xff]   ;;  %v5304_v47 = vld [vmem:[#allocation2 + $0x6c] ss:$16 sps:$4 sm:$0xff]  }
 0x20d   :  { %2618 = vmatpush1.bf16.msra.mxu1 %v5223_v48  ;;  %2578 = vmatprep.subr.bf16.mxu0 %v5224_v20  ;;  %v5262_v12 = vld [vmem:[#allocation2 + $0x344] ss:$16 sps:$4 sm:$0xff]   ;;  %v5265_v45 = vld [vmem:[#allocation2 + $0x340] ss:$16 sps:$4 sm:$0xff]   ;;  %v5307_v48 = vld [vmem:[#allocation2 + $0x26c] ss:$16 sps:$4 sm:$0xff]  }
 0x20e   :  { %2619 = vmatprep.subr.bf16.mxu1 %v5226_v3  ;;  %v5266_v15 = vld [vmem:[#allocation2 + $0x124] ss:$16 sps:$4 sm:$0xff]   ;;  %v5270_v17 = vld [vmem:[#allocation2 + $0x120] ss:$16 sps:$4 sm:$0xff]   ;;  %v5302_v20 = vld [vmem:[#allocation2 + $0x68] ss:$16 sps:$4 sm:$0xff]  }
 0x20f   :  { %v5268_v16 = vld [vmem:[#allocation2 + $0x324] ss:$16 sps:$4 sm:$0xff]   ;;  %v5271_v62 = vld [vmem:[#allocation2 + $0x320] ss:$16 sps:$4 sm:$0xff]   ;;  %v5313_v3 = vld [vmem:[#allocation2 + $0x24c] ss:$16 sps:$4 sm:$0xff]  }
 0x210   :  { %2579 = vmatpush1.bf16.msra.mxu0 %v5228_v49  ;;  %v5272_v18 = vld [vmem:[#allocation2 + $0x104] ss:$16 sps:$4 sm:$0xff]   ;;  %v5276_v22 = vld [vmem:[#allocation2 + $0x100] ss:$16 sps:$4 sm:$0xff]   ;;  %v5308_v49 = vld [vmem:[#allocation2 + $0x48] ss:$16 sps:$4 sm:$0xff]  }
 0x211   :  { %2620 = vmatpush1.bf16.msra.mxu1 %v5229_v50  ;;  %2580 = vmatprep.subr.bf16.mxu0 %v5230_v51  ;;  %v5274_v21 = vld [vmem:[#allocation2 + $0x304] ss:$16 sps:$4 sm:$0xff]   ;;  %v5277_v1 = vld [vmem:[#allocation2 + $0x300] ss:$16 sps:$4 sm:$0xff]   ;;  %v5311_v50 = vld [vmem:[#allocation2 + $0x248] ss:$16 sps:$4 sm:$0xff]  }
 0x212   :  { %2621 = vmatprep.subr.bf16.mxu1 %v5232_v19  ;;  %v5316_v51 = vld [vmem:[#allocation2 + $0x2c] ss:$16 sps:$4 sm:$0xff]  }
 0x213   :  { %v5319_v19 = vld [vmem:[#allocation2 + $0x22c] ss:$16 sps:$4 sm:$0xff]  }
 0x214   :  { %2581 = vmatpush2.bf16.msra.mxu0 %v5234_v29  ;;  %v5314_v29 = vld [vmem:[#allocation2 + $0x28] ss:$16 sps:$4 sm:$0xff]  }
 0x215   :  { %2622 = vmatpush2.bf16.msra.mxu1 %v5235_v52  ;;  %2582 = vmatprep.subr.bf16.mxu0 %v5236_v53  ;;  %v5317_v52 = vld [vmem:[#allocation2 + $0x228] ss:$16 sps:$4 sm:$0xff]   ;;  %v5322_v53 = vld [vmem:[#allocation2 + $0xc] ss:$16 sps:$4 sm:$0xff]  }
 0x216   :  { %2623 = vmatprep.subr.bf16.mxu1 %v5238_v32  ;;  %v5325_v32 = vld [vmem:[#allocation2 + $0x20c] ss:$16 sps:$4 sm:$0xff]  }
 0x218   :  { %2583 = vmatpush2.bf16.msra.mxu0 %v5240_v31  ;;  %v5320_v31 = vld [vmem:[#allocation2 + $0x8] ss:$16 sps:$4 sm:$0xff]  }
 0x219   :  { %2624 = vmatpush2.bf16.msra.mxu1 %v5241_v26  ;;  %2584 = vmatprep.subr.bf16.mxu0 %v5242_v59  ;;  %v5323_v26 = vld [vmem:[#allocation2 + $0x208] ss:$16 sps:$4 sm:$0xff]   ;;  %v5328_v59 = vld [vmem:[#allocation2 + $0x1ec] ss:$16 sps:$4 sm:$0xff]  }
 0x21a   :  { %2625 = vmatprep.subr.bf16.mxu1 %v5244_v60  ;;  %v5331_v60 = vld [vmem:[#allocation2 + $0x3ec] ss:$16 sps:$4 sm:$0xff]  }
 0x21c   :  { %2585 = vmatpush2.bf16.msra.mxu0 %v5246_v61  ;;  %v5326_v61 = vld [vmem:[#allocation2 + $0x1e8] ss:$16 sps:$4 sm:$0xff]  }
 0x21d   :  { %2626 = vmatpush2.bf16.msra.mxu1 %v5247_v63  ;;  %2586 = vmatprep.subr.bf16.mxu0 %v5248_v0  ;;  %v5329_v63 = vld [vmem:[#allocation2 + $0x3e8] ss:$16 sps:$4 sm:$0xff]   ;;  %v5334_v0 = vld [vmem:[#allocation2 + $0x1cc] ss:$16 sps:$4 sm:$0xff]  }
 0x21e   :  { %2627 = vmatprep.subr.bf16.mxu1 %v5250_v2  ;;  %v5337_v2 = vld [vmem:[#allocation2 + $0x3cc] ss:$16 sps:$4 sm:$0xff]  }
 0x220   :  { %2587 = vmatpush2.bf16.msra.mxu0 %v5252_v4  ;;  %v5332_v4 = vld [vmem:[#allocation2 + $0x1c8] ss:$16 sps:$4 sm:$0xff]  }
 0x221   :  { %2628 = vmatpush2.bf16.msra.mxu1 %v5253_v5  ;;  %2588 = vmatprep.subr.bf16.mxu0 %v5254_v6  ;;  %v5335_v5 = vld [vmem:[#allocation2 + $0x3c8] ss:$16 sps:$4 sm:$0xff]   ;;  %v5340_v6 = vld [vmem:[#allocation2 + $0x1ac] ss:$16 sps:$4 sm:$0xff]  }
 0x222   :  { %2629 = vmatprep.subr.bf16.mxu1 %v5256_v7  ;;  %v5343_v7 = vld [vmem:[#allocation2 + $0x3ac] ss:$16 sps:$4 sm:$0xff]  }
 0x224   :  { %2589 = vmatpush2.bf16.msra.mxu0 %v5258_v8  ;;  %v5338_v8 = vld [vmem:[#allocation2 + $0x1a8] ss:$16 sps:$4 sm:$0xff]  }
 0x225   :  { %2630 = vmatpush2.bf16.msra.mxu1 %v5259_v9  ;;  %2590 = vmatprep.subr.bf16.mxu0 %v5260_v10  ;;  %v5341_v9 = vld [vmem:[#allocation2 + $0x3a8] ss:$16 sps:$4 sm:$0xff]   ;;  %v5346_v10 = vld [vmem:[#allocation2 + $0x18c] ss:$16 sps:$4 sm:$0xff]  }
 0x226   :  { %2631 = vmatprep.subr.bf16.mxu1 %v5262_v12  ;;  %v5349_v12 = vld [vmem:[#allocation2 + $0x38c] ss:$16 sps:$4 sm:$0xff]  }
 0x228   :  { %2591 = vmatpush2.bf16.msra.mxu0 %v5264_v42  ;;  %v5344_v42 = vld [vmem:[#allocation2 + $0x188] ss:$16 sps:$4 sm:$0xff]  }
 0x229   :  { %2632 = vmatpush2.bf16.msra.mxu1 %v5265_v45  ;;  %2592 = vmatprep.subr.bf16.mxu0 %v5266_v15  ;;  %v5347_v45 = vld [vmem:[#allocation2 + $0x388] ss:$16 sps:$4 sm:$0xff]   ;;  %v5352_v15 = vld [vmem:[#allocation2 + $0x16c] ss:$16 sps:$4 sm:$0xff]  }
 0x22a   :  { %2633 = vmatprep.subr.bf16.mxu1 %v5268_v16  ;;  %v5355_v16 = vld [vmem:[#allocation2 + $0x36c] ss:$16 sps:$4 sm:$0xff]  }
 0x22c   :  { %2593 = vmatpush2.bf16.msra.mxu0 %v5270_v17  ;;  %v5350_v17 = vld [vmem:[#allocation2 + $0x168] ss:$16 sps:$4 sm:$0xff]  }
 0x22d   :  { %2634 = vmatpush2.bf16.msra.mxu1 %v5271_v62  ;;  %2594 = vmatprep.subr.bf16.mxu0 %v5272_v18  ;;  %v5353_v62 = vld [vmem:[#allocation2 + $0x368] ss:$16 sps:$4 sm:$0xff]   ;;  %v5358_v18 = vld [vmem:[#allocation2 + $0x14c] ss:$16 sps:$4 sm:$0xff]  }
 0x22e   :  { %2635 = vmatprep.subr.bf16.mxu1 %v5274_v21  ;;  %v5361_v21 = vld [vmem:[#allocation2 + $0x34c] ss:$16 sps:$4 sm:$0xff]  }
 0x230   :  { %2595 = vmatpush2.bf16.msra.mxu0 %v5276_v22  ;;  %v5356_v22 = vld [vmem:[#allocation2 + $0x148] ss:$16 sps:$4 sm:$0xff]  }
 0x231   :  { %2636 = vmatpush2.bf16.msra.mxu1 %v5277_v1  ;;  %2646 = vmatprep.subr.bf16.mxu0 %v5280_v23  ;;  %v5359_v1 = vld [vmem:[#allocation2 + $0x348] ss:$16 sps:$4 sm:$0xff]   ;;  %v5364_v23 = vld [vmem:[#allocation2 + $0x12c] ss:$16 sps:$4 sm:$0xff]  }
 0x232   :  { %2687 = vmatprep.subr.bf16.mxu1 %v5283_v24  ;;  %v5367_v24 = vld [vmem:[#allocation2 + $0x32c] ss:$16 sps:$4 sm:$0xff]  }
 0x233   :  { %2597 = vmatmul.mubr.bf16.vlgmr.msra.gmra.mxu0 %v5907_v55 }
 0x234   :  { %2638 = vmatmul.mubr.bf16.vlgmr.msra.gmra.mxu1 %v5931_v11  ;;  %2647 = vmatpush1.bf16.msra.mxu0 %v5278_v25  ;;  %v5362_v25 = vld [vmem:[#allocation2 + $0x128] ss:$16 sps:$4 sm:$0xff]  }
 0x235   :  { %2688 = vmatpush1.bf16.msra.mxu1 %v5281_v27  ;;  %2648 = vmatprep.subr.bf16.mxu0 %v5286_v28  ;;  %v5365_v27 = vld [vmem:[#allocation2 + $0x328] ss:$16 sps:$4 sm:$0xff]   ;;  %v5370_v28 = vld [vmem:[#allocation2 + $0x10c] ss:$16 sps:$4 sm:$0xff]  }
 0x236   :  { %2689 = vmatprep.subr.bf16.mxu1 %v5289_v30  ;;  %2678 = vmatprep.mubr.bf16.mxu0 %v5910_v57  ;;  %v5305_v57 = vld [vmem:[#allocation2 + $0x268] ss:$16 sps:$4 sm:$0xff]   ;;  %v5373_v30 = vld [vmem:[#allocation2 + $0x30c] ss:$16 sps:$4 sm:$0xff]  }
 0x237   :  { %2719 = vmatprep.mubr.bf16.mxu1 %v5934_v14  ;;  %v5310_v14 = vld [vmem:[#allocation2 + $0x4c] ss:$16 sps:$4 sm:$0xff]  }
 0x238   :  { %2649 = vmatpush1.bf16.msra.mxu0 %v5284_v33  ;;  %v5368_v33 = vld [vmem:[#allocation2 + $0x108] ss:$16 sps:$4 sm:$0xff]  }
 0x239   :  { %2690 = vmatpush1.bf16.msra.mxu1 %v5287_v34  ;;  %2650 = vmatprep.subr.bf16.mxu0 %v5292_v35  ;;  %v5371_v34 = vld [vmem:[#allocation2 + $0x308] ss:$16 sps:$4 sm:$0xff]  }
 0x23a   :  { %2691 = vmatprep.subr.bf16.mxu1 %v5295_v36 }
 0x23c   :  { %2651 = vmatpush1.bf16.msra.mxu0 %v5290_v37 }
 0x23d   :  { %2692 = vmatpush1.bf16.msra.mxu1 %v5293_v38  ;;  %2652 = vmatprep.subr.bf16.mxu0 %v5298_v39 }
 0x23e   :  { %2693 = vmatprep.subr.bf16.mxu1 %v5301_v40 }
 0x240   :  { %2653 = vmatpush1.bf16.msra.mxu0 %v5296_v13 }
 0x241   :  { %2694 = vmatpush1.bf16.msra.mxu1 %v5299_v41  ;;  %2654 = vmatprep.subr.bf16.mxu0 %v5304_v47 }
 0x242   :  { %2695 = vmatprep.subr.bf16.mxu1 %v5307_v48 }
 0x244   :  { %2655 = vmatpush1.bf16.msra.mxu0 %v5302_v20 }
 0x245   :  { %2696 = vmatpush1.bf16.msra.mxu1 %v5305_v57  ;;  %2656 = vmatprep.subr.bf16.mxu0 %v5310_v14 }
 0x246   :  { %2697 = vmatprep.subr.bf16.mxu1 %v5313_v3 }
 0x248   :  { %2657 = vmatpush1.bf16.msra.mxu0 %v5308_v49 }
 0x249   :  { %2698 = vmatpush1.bf16.msra.mxu1 %v5311_v50  ;;  %2658 = vmatprep.subr.bf16.mxu0 %v5316_v51 }
 0x24a   :  { %2699 = vmatprep.subr.bf16.mxu1 %v5319_v19 }
 0x24c   :  { %2659 = vmatpush1.bf16.msra.mxu0 %v5314_v29 }
 0x24d   :  { %2700 = vmatpush1.bf16.msra.mxu1 %v5317_v52  ;;  %2660 = vmatprep.subr.bf16.mxu0 %v5322_v53 }
 0x24e   :  { %2701 = vmatprep.subr.bf16.mxu1 %v5325_v32 }
 0x250   :  { %2661 = vmatpush1.bf16.msra.mxu0 %v5320_v31 }
 0x251   :  { %2702 = vmatpush1.bf16.msra.mxu1 %v5323_v26  ;;  %2662 = vmatprep.subr.bf16.mxu0 %v5328_v59 }
 0x252   :  { %2703 = vmatprep.subr.bf16.mxu1 %v5331_v60 }
 0x254   :  { %2663 = vmatpush2.bf16.msra.mxu0 %v5326_v61 }
 0x255   :  { %2704 = vmatpush2.bf16.msra.mxu1 %v5329_v63  ;;  %2664 = vmatprep.subr.bf16.mxu0 %v5334_v0 }
 0x256   :  { %2705 = vmatprep.subr.bf16.mxu1 %v5337_v2 }
 0x258   :  { %2665 = vmatpush2.bf16.msra.mxu0 %v5332_v4 }
 0x259   :  { %2706 = vmatpush2.bf16.msra.mxu1 %v5335_v5  ;;  %2666 = vmatprep.subr.bf16.mxu0 %v5340_v6 }
 0x25a   :  { %2707 = vmatprep.subr.bf16.mxu1 %v5343_v7 }
 0x25c   :  { %2667 = vmatpush2.bf16.msra.mxu0 %v5338_v8 }
 0x25d   :  { %2708 = vmatpush2.bf16.msra.mxu1 %v5341_v9  ;;  %2668 = vmatprep.subr.bf16.mxu0 %v5346_v10 }
 0x25e   :  { %2709 = vmatprep.subr.bf16.mxu1 %v5349_v12 }
 0x260   :  { %2669 = vmatpush2.bf16.msra.mxu0 %v5344_v42 }
 0x261   :  { %2710 = vmatpush2.bf16.msra.mxu1 %v5347_v45  ;;  %2670 = vmatprep.subr.bf16.mxu0 %v5352_v15 }
 0x262   :  { %2711 = vmatprep.subr.bf16.mxu1 %v5355_v16 }
 0x264   :  { %2671 = vmatpush2.bf16.msra.mxu0 %v5350_v17 }
 0x265   :  { %2712 = vmatpush2.bf16.msra.mxu1 %v5353_v62  ;;  %2672 = vmatprep.subr.bf16.mxu0 %v5358_v18 }
 0x266   :  { %2713 = vmatprep.subr.bf16.mxu1 %v5361_v21 }
 0x268   :  { %2673 = vmatpush2.bf16.msra.mxu0 %v5356_v22  ;;  %v5949_v22 = vsub.s32 2, %v5824_v43 }
 0x269   :  { %2714 = vmatpush2.bf16.msra.mxu1 %v5359_v1  ;;  %2674 = vmatprep.subr.bf16.mxu0 %v5364_v23  ;;  %v5952_v1 = vsub.s32 3, %v5824_v43 }
 0x26a   :  { %2715 = vmatprep.subr.bf16.mxu1 %v5367_v24  ;;  %v2815_v23 = vrot.slane %v5891_v44, %v5949_v22 }
 0x26c   :  { %2675 = vmatpush2.bf16.msra.mxu0 %v5362_v25 }
 0x26d   :  { %2716 = vmatpush2.bf16.msra.mxu1 %v5365_v27  ;;  %2676 = vmatprep.subr.bf16.mxu0 %v5370_v28  ;;  %v2835_v27 = vrot.slane %v5891_v44, %v5952_v1  ;;  %v2819_v28 = vrot.slane %v5896_v46, %v5949_v22 }
 0x26e   :  { %2717 = vmatprep.subr.bf16.mxu1 %v5373_v30 }
 0x270   :  { %2677 = vmatpush2.bf16.msra.mxu0 %v5368_v33 }
 0x271   :  { %2718 = vmatpush2.bf16.msra.mxu1 %v5371_v34 }
 0x273   :  { %2679 = vmatmul.mubr.bf16.vlgmr.msra.gmra.mxu0 %v5907_v55 }
 0x274   :  { %2720 = vmatmul.mubr.bf16.vlgmr.msra.gmra.mxu1 %v5931_v11 }
 0x2f3   :  { %v2598_v35 = vpop.f32.mrf.mxu0 }
 0x2f4   :  { %v2639_v36 = vpop.f32.mrf.mxu1 }
 0x2f5   :  { %v2640_v37 = vadd.f32 %v2639_v36, %v2598_v35  ;;  %v2600_v38 = vpop.f32.mrf.mxu0  ;;  %v2839_v35 = vrot.slane %v5896_v46, %v5952_v1 }
 0x2f6   :  { %v2641_v39 = vpop.f32.mrf.mxu1 }
 0x2f7   :  { %v2728_v40 = vsel %vm1654_vm1, %v2640_v37, 0.0  ;;  %v2642_v13 = vadd.f32 %v2641_v39, %v2600_v38  ;;  %v2602_v47 = vpop.f32.mrf.mxu0 }
 0x2f8   :  { %v2729_v41 = vrot.slane %v2728_v40, 4  ;;  %v2643_v48 = vpop.f32.mrf.mxu1 }
 0x2f9   :  { %v2735_v20 = vsel %vm1654_vm1, %v2642_v13, 0.0  ;;  %v2603_v3 = vpop.f32.mrf.mxu0 }
 0x2fa   :  { %v2730_v57 = vadd.f32 %v2729_v41, %v2728_v40  ;;  %v2736_v14 = vrot.slane %v2735_v20, 4  ;;  %v2644_v49 = vpop.f32.mrf.mxu1 }
 0x2fc   :  { %v2731_v55 = vrot.slane %v2730_v57, 2  ;;  %v2737_v50 = vadd.f32 %v2736_v14, %v2735_v20 }
 0x2fe   :  { %v2732_v11 = vadd.f32 %v2731_v55, %v2730_v57  ;;  %v2738_v51 = vrot.slane %v2737_v50, 2 }
 0x300   :  { %v2733_v19 = vrot.slane %v2732_v11, 1  ;;  %v2739_v29 = vadd.f32 %v2738_v51, %v2737_v50 }
 0x302   :  { %v2734_v52 = vadd.f32 %v2733_v19, %v2732_v11  ;;  %v2740_v53 = vrot.slane %v2739_v29, 1 }
 0x304   :  { %v2756_v32 = vmul.f32 0.5, %v2734_v52  ;;  %v2741_v31 = vadd.f32 %v2740_v53, %v2739_v29 }
 0x306   :  { %v2760_v26 = vsub.f32 %v2640_v37, %v2756_v32  ;;  %v2757_v59 = vmul.f32 0.5, %v2741_v31 }
 0x308   :  { %v2764_v60 = vmul.f32 %v2760_v26, %v2760_v26  ;;  %v2761_v61 = vsub.f32 %v2642_v13, %v2757_v59 }
 0x30a   :  { %v2768_v63 = vsel %vm1654_vm1, %v2764_v60, 0.0  ;;  %v2765_v0 = vmul.f32 %v2761_v61, %v2761_v61 }
 0x30b   :  { %v2769_v2 = vrot.slane %v2768_v63, 4 }
 0x30c   :  { %v2775_v4 = vsel %vm1654_vm1, %v2765_v0, 0.0 }
 0x30d   :  { %v2770_v5 = vadd.f32 %v2769_v2, %v2768_v63  ;;  %v2776_v6 = vrot.slane %v2775_v4, 4 }
 0x30f   :  { %v2771_v7 = vrot.slane %v2770_v5, 2  ;;  %v2777_v8 = vadd.f32 %v2776_v6, %v2775_v4 }
 0x311   :  { %v2772_v9 = vadd.f32 %v2771_v7, %v2770_v5  ;;  %v2778_v10 = vrot.slane %v2777_v8, 2 }
 0x313   :  { %v2773_v12 = vrot.slane %v2772_v9, 1  ;;  %v2779_v42 = vadd.f32 %v2778_v10, %v2777_v8 }
 0x315   :  { %v2774_v45 = vadd.f32 %v2773_v12, %v2772_v9  ;;  %v2780_v15 = vrot.slane %v2779_v42, 1 }
 0x317   :  { %v2796_v16 = vmul.f32 0.5, %v2774_v45  ;;  %v2781_v17 = vadd.f32 %v2780_v15, %v2779_v42 }
 0x319   :  { %v2800_v62 = vadd.f32 1e-05, %v2796_v16  ;;  %v2797_v18 = vmul.f32 0.5, %v2781_v17 }
 0x31b   :  { %5374 = vrsqrt.f32 %v2800_v62  ;;  %v2801_v21 = vadd.f32 1e-05, %v2797_v18 }
 0x31d   :  { %5376 = vrsqrt.f32 %v2801_v21 }
 0x328   :  { %v5375_v24 = vpop.eup %5374 }
 0x329   :  { %v2808_v25 = vmul.f32 %v5375_v24, %v2760_v26 }
 0x32a   :  { %v5377_v30 = vpop.eup %5376 }
 0x32b   :  { %v2828_v33 = vmul.f32 %v2815_v23, %v2808_v25  ;;  %v2809_v34 = vmul.f32 %v5377_v30, %v2761_v61 }
 0x32d   :  { %v2848_v36 = vadd.f32 %v2835_v27, %v2828_v33  ;;  %v2829_v37 = vmul.f32 %v2819_v28, %v2809_v34 }
 0x32f   :  { %vm2852_vm6 = vcmp.ge.f32.partialorder %v2848_v36, 0.0  ;;  %v2849_v38 = vadd.f32 %v2839_v35, %v2829_v37  ;;  %v2823_v35 = vrot.slane %v5918_v56, %v5949_v22 }
 0x330   :  { %v2856_v39 = vsel %vm2852_vm6, 1.0, %v5778_v54 }
 0x331   :  { %v5963_v40 = vpack.c.bf16 %v2856_v39, %v2856_v39  ;;  %vm2853_vm7 = vcmp.ge.f32.partialorder %v2849_v38, 0.0  ;;  %v2843_v38 = vrot.slane %v5918_v56, %v5952_v1  ;;  %v2827_v39 = vrot.slane %v5920_v58, %v5949_v22 }
 0x332   :  { %v2857_v13 = vsel %vm2853_vm7, 1.0, %v5778_v54 }
 0x333   :  { %v5966_v41 = vpack.c.bf16 %v2857_v13, %v2857_v13  ;;  %v2680_v47 = vpop.f32.mrf.mxu0 }
 0x334   :  { %v2721_v48 = vpop.f32.mrf.mxu1 }
 0x335   :  { %v2722_v20 = vadd.f32 %v2721_v48, %v2680_v47  ;;  %v2682_v57 = vpop.f32.mrf.mxu0 }
 0x336   :  { %v2723_v14 = vpop.f32.mrf.mxu1 }
 0x337   :  { %v2742_v3 = vsel %vm1654_vm1, %v2722_v20, 0.0  ;;  %v2724_v49 = vadd.f32 %v2723_v14, %v2682_v57  ;;  %v2684_v50 = vpop.f32.mrf.mxu0 }
 0x338   :  { %v2743_v55 = vrot.slane %v2742_v3, 4  ;;  %v2725_v11 = vpop.f32.mrf.mxu1 }
 0x339   :  { %v2749_v51 = vsel %vm1654_vm1, %v2724_v49, 0.0  ;;  %v2685_v52 = vpop.f32.mrf.mxu0 }
 0x33a   :  { %v2744_v19 = vadd.f32 %v2743_v55, %v2742_v3  ;;  %v2750_v29 = vrot.slane %v2749_v51, 4  ;;  %v2726_v53 = vpop.f32.mrf.mxu1 }
 0x33c   :  { %v2745_v32 = vrot.slane %v2744_v19, 2  ;;  %v2751_v31 = vadd.f32 %v2750_v29, %v2749_v51 }
 0x33e   :  { %v2746_v26 = vadd.f32 %v2745_v32, %v2744_v19  ;;  %v2752_v59 = vrot.slane %v2751_v31, 2 }
 0x340   :  { %v2747_v60 = vrot.slane %v2746_v26, 1  ;;  %v2753_v61 = vadd.f32 %v2752_v59, %v2751_v31 }
 0x342   :  { %v2748_v63 = vadd.f32 %v2747_v60, %v2746_v26  ;;  %v2754_v0 = vrot.slane %v2753_v61, 1 }
 0x344   :  { %v2758_v2 = vmul.f32 0.5, %v2748_v63  ;;  %v2755_v4 = vadd.f32 %v2754_v0, %v2753_v61 }
 0x346   :  { %v2762_v5 = vsub.f32 %v2722_v20, %v2758_v2  ;;  %v2759_v6 = vmul.f32 0.5, %v2755_v4  ;;  %v2847_v20 = vrot.slane %v5920_v58, %v5952_v1 }
 0x348   :  { %v2766_v7 = vmul.f32 %v2762_v5, %v2762_v5  ;;  %v2763_v8 = vsub.f32 %v2724_v49, %v2759_v6 }
 0x34a   :  { %v2782_v9 = vsel %vm1654_vm1, %v2766_v7, 0.0  ;;  %v2767_v10 = vmul.f32 %v2763_v8, %v2763_v8 }
 0x34b   :  { %v2783_v12 = vrot.slane %v2782_v9, 4 }
 0x34c   :  { %v2789_v42 = vsel %vm1654_vm1, %v2767_v10, 0.0 }
 0x34d   :  { %v2784_v45 = vadd.f32 %v2783_v12, %v2782_v9  ;;  %v2790_v15 = vrot.slane %v2789_v42, 4 }
 0x34f   :  { %v2785_v16 = vrot.slane %v2784_v45, 2  ;;  %v2791_v17 = vadd.f32 %v2790_v15, %v2789_v42 }
 0x351   :  { %v2786_v62 = vadd.f32 %v2785_v16, %v2784_v45  ;;  %v2792_v18 = vrot.slane %v2791_v17, 2 }
 0x353   :  { %v2787_v21 = vrot.slane %v2786_v62, 1  ;;  %v2793_v23 = vadd.f32 %v2792_v18, %v2791_v17 }
 0x355   :  { %v2788_v24 = vadd.f32 %v2787_v21, %v2786_v62  ;;  %v2794_v25 = vrot.slane %v2793_v23, 1 }
 0x357   :  { %v2798_v27 = vmul.f32 0.5, %v2788_v24  ;;  %v2795_v28 = vadd.f32 %v2794_v25, %v2793_v23 }
 0x359   :  { %v2802_v30 = vadd.f32 1e-05, %v2798_v27  ;;  %v2799_v33 = vmul.f32 0.5, %v2795_v28 }
 0x35b   :  { %5378 = vrsqrt.f32 %v2802_v30  ;;  %v2803_v34 = vadd.f32 1e-05, %v2799_v33 }
 0x35d   :  { %5380 = vrsqrt.f32 %v2803_v34 }
 0x368   :  { %v5379_v36 = vpop.eup %5378 }
 0x369   :  { %v2810_v37 = vmul.f32 %v5379_v36, %v2762_v5 }
 0x36a   :  { %v5381_v13 = vpop.eup %5380 }
 0x36b   :  { %v2830_v47 = vmul.f32 %v2823_v35, %v2810_v37  ;;  %v2811_v48 = vmul.f32 %v5381_v13, %v2763_v8 }
 0x36d   :  { %v2850_v57 = vadd.f32 %v2843_v38, %v2830_v47  ;;  %v2831_v14 = vmul.f32 %v2827_v39, %v2811_v48 }
 0x36f   :  { %vm2854_vm8 = vcmp.ge.f32.partialorder %v2850_v57, 0.0  ;;  %v2851_v3 = vadd.f32 %v2847_v20, %v2831_v14 }
 0x370   :  { %v2858_v49 = vsel %vm2854_vm8, 1.0, %v5778_v54 }
 0x371   :  { %v5981_v55 = vpack.c.bf16 %v2858_v49, %v2858_v49  ;;  %vm2855_vm9 = vcmp.ge.f32.partialorder %v2851_v3, 0.0 }
 0x372   :  { %v2859_v50 = vsel %vm2855_vm9, 1.0, %v5778_v54 }
 0x373   :  { %v5984_v11 = vpack.c.bf16 %v2859_v50, %v2859_v50 }
 0x374   :  { %5762 = dma.done.wait [#allocation5 + $0x1], 16384 }
 0x375   :  { %5763 = vsyncadd [#allocation5 + $0x1], 4294950912  ;;  %3666 = vmatprep.mubr.bf16.mxu0 %v5966_v41  ;;  %3707 = vmatprep.mubr.bf16.mxu1 %v5984_v11  ;;  %v5382_v22 = vld [vmem:[#allocation3 + $0xe4] ss:$16 sps:$4 sm:$0xff]   ;;  %v5386_v51 = vld [vmem:[#allocation3 + $0xe0] ss:$16 sps:$4 sm:$0xff]  }
 0x376   :  { %v5384_v1 = vld [vmem:[#allocation3 + $0x2e4] ss:$16 sps:$4 sm:$0xff]   ;;  %3634 = vmatprep.subr.bf16.mxu0 %v5382_v22  ;;  %v5387_v19 = vld [vmem:[#allocation3 + $0x2e0] ss:$16 sps:$4 sm:$0xff]  }
 0x377   :  { %3675 = vmatprep.subr.bf16.mxu1 %v5384_v1  ;;  %v5388_v29 = vld [vmem:[#allocation3 + $0xc4] ss:$16 sps:$4 sm:$0xff]   ;;  %3635 = vmatpush1.bf16.msra.mxu0 %v5386_v51  ;;  %v5392_v53 = vld [vmem:[#allocation3 + $0xc0] ss:$16 sps:$4 sm:$0xff]  }
 0x378   :  { %3676 = vmatpush1.bf16.msra.mxu1 %v5387_v19  ;;  %v5390_v52 = vld [vmem:[#allocation3 + $0x2c4] ss:$16 sps:$4 sm:$0xff]   ;;  %3636 = vmatprep.subr.bf16.mxu0 %v5388_v29  ;;  %v5393_v54 = vld [vmem:[#allocation3 + $0x2c0] ss:$16 sps:$4 sm:$0xff]  }
 0x379   :  { %3677 = vmatprep.subr.bf16.mxu1 %v5390_v52  ;;  %v5394_v32 = vld [vmem:[#allocation3 + $0xa4] ss:$16 sps:$4 sm:$0xff]   ;;  %v5398_v26 = vld [vmem:[#allocation3 + $0xa0] ss:$16 sps:$4 sm:$0xff]  }
 0x37a   :  { %v5396_v31 = vld [vmem:[#allocation3 + $0x2a4] ss:$16 sps:$4 sm:$0xff]   ;;  %v5399_v59 = vld [vmem:[#allocation3 + $0x2a0] ss:$16 sps:$4 sm:$0xff]  }
 0x37b   :  { %3637 = vmatpush1.bf16.msra.mxu0 %v5392_v53  ;;  %v5400_v60 = vld [vmem:[#allocation3 + $0x84] ss:$16 sps:$4 sm:$0xff]   ;;  %v5404_v63 = vld [vmem:[#allocation3 + $0x80] ss:$16 sps:$4 sm:$0xff]  }
 0x37c   :  { %3678 = vmatpush1.bf16.msra.mxu1 %v5393_v54  ;;  %3638 = vmatprep.subr.bf16.mxu0 %v5394_v32  ;;  %v5402_v61 = vld [vmem:[#allocation3 + $0x284] ss:$16 sps:$4 sm:$0xff]   ;;  %v5405_v0 = vld [vmem:[#allocation3 + $0x280] ss:$16 sps:$4 sm:$0xff]  }
 0x37d   :  { %3679 = vmatprep.subr.bf16.mxu1 %v5396_v31  ;;  %v5406_v2 = vld [vmem:[#allocation3 + $0x64] ss:$16 sps:$4 sm:$0xff]   ;;  %v5410_v5 = vld [vmem:[#allocation3 + $0x60] ss:$16 sps:$4 sm:$0xff]   ;;  %v5480_v31 = vld [vmem:[#allocation3 + $0xec] ss:$16 sps:$4 sm:$0xff]  }
 0x37e   :  { %v5408_v4 = vld [vmem:[#allocation3 + $0x264] ss:$16 sps:$4 sm:$0xff]   ;;  %v5411_v6 = vld [vmem:[#allocation3 + $0x260] ss:$16 sps:$4 sm:$0xff]  }
 0x37f   :  { %3639 = vmatpush1.bf16.msra.mxu0 %v5398_v26  ;;  %v5412_v7 = vld [vmem:[#allocation3 + $0x44] ss:$16 sps:$4 sm:$0xff]   ;;  %v5416_v9 = vld [vmem:[#allocation3 + $0x40] ss:$16 sps:$4 sm:$0xff]   ;;  %v5483_v26 = vld [vmem:[#allocation3 + $0x2ec] ss:$16 sps:$4 sm:$0xff]  }
 0x380   :  { %3680 = vmatpush1.bf16.msra.mxu1 %v5399_v59  ;;  %3640 = vmatprep.subr.bf16.mxu0 %v5400_v60  ;;  %v5414_v8 = vld [vmem:[#allocation3 + $0x244] ss:$16 sps:$4 sm:$0xff]   ;;  %v5417_v10 = vld [vmem:[#allocation3 + $0x240] ss:$16 sps:$4 sm:$0xff]   ;;  %v5478_v59 = vld [vmem:[#allocation3 + $0xe8] ss:$16 sps:$4 sm:$0xff]  }
 0x381   :  { %3681 = vmatprep.subr.bf16.mxu1 %v5402_v61  ;;  %v5418_v12 = vld [vmem:[#allocation3 + $0x24] ss:$16 sps:$4 sm:$0xff]   ;;  %v5422_v45 = vld [vmem:[#allocation3 + $0x20] ss:$16 sps:$4 sm:$0xff]   ;;  %v5481_v60 = vld [vmem:[#allocation3 + $0x2e8] ss:$16 sps:$4 sm:$0xff]  }
 0x382   :  { %v5420_v42 = vld [vmem:[#allocation3 + $0x224] ss:$16 sps:$4 sm:$0xff]   ;;  %v5423_v15 = vld [vmem:[#allocation3 + $0x220] ss:$16 sps:$4 sm:$0xff]   ;;  %v5486_v61 = vld [vmem:[#allocation3 + $0xcc] ss:$16 sps:$4 sm:$0xff]  }
 0x383   :  { %3641 = vmatpush1.bf16.msra.mxu0 %v5404_v63  ;;  %v5424_v16 = vld [vmem:[#allocation3 + $0x4] ss:$16 sps:$4 sm:$0xff]   ;;  %v5428_v62 = vld [vmem:[#allocation3] ss:$16 sps:$4 sm:$0xff]   ;;  %v5489_v63 = vld [vmem:[#allocation3 + $0x2cc] ss:$16 sps:$4 sm:$0xff]  }
 0x384   :  { %3682 = vmatpush1.bf16.msra.mxu1 %v5405_v0  ;;  %3642 = vmatprep.subr.bf16.mxu0 %v5406_v2  ;;  %v5426_v17 = vld [vmem:[#allocation3 + $0x204] ss:$16 sps:$4 sm:$0xff]   ;;  %v5429_v18 = vld [vmem:[#allocation3 + $0x200] ss:$16 sps:$4 sm:$0xff]   ;;  %v5484_v0 = vld [vmem:[#allocation3 + $0xc8] ss:$16 sps:$4 sm:$0xff]  }
 0x385   :  { %3683 = vmatprep.subr.bf16.mxu1 %v5408_v4  ;;  %v5430_v21 = vld [vmem:[#allocation3 + $0x1e4] ss:$16 sps:$4 sm:$0xff]   ;;  %v5434_v24 = vld [vmem:[#allocation3 + $0x1e0] ss:$16 sps:$4 sm:$0xff]   ;;  %v5487_v2 = vld [vmem:[#allocation3 + $0x2c8] ss:$16 sps:$4 sm:$0xff]  }
 0x386   :  { %v5432_v23 = vld [vmem:[#allocation3 + $0x3e4] ss:$16 sps:$4 sm:$0xff]   ;;  %v5435_v25 = vld [vmem:[#allocation3 + $0x3e0] ss:$16 sps:$4 sm:$0xff]   ;;  %v5492_v4 = vld [vmem:[#allocation3 + $0xac] ss:$16 sps:$4 sm:$0xff]  }
 0x387   :  { %3643 = vmatpush1.bf16.msra.mxu0 %v5410_v5  ;;  %v5436_v27 = vld [vmem:[#allocation3 + $0x1c4] ss:$16 sps:$4 sm:$0xff]   ;;  %v5440_v30 = vld [vmem:[#allocation3 + $0x1c0] ss:$16 sps:$4 sm:$0xff]   ;;  %v5495_v5 = vld [vmem:[#allocation3 + $0x2ac] ss:$16 sps:$4 sm:$0xff]  }
 0x388   :  { %3684 = vmatpush1.bf16.msra.mxu1 %v5411_v6  ;;  %3644 = vmatprep.subr.bf16.mxu0 %v5412_v7  ;;  %v5438_v28 = vld [vmem:[#allocation3 + $0x3c4] ss:$16 sps:$4 sm:$0xff]   ;;  %v5441_v33 = vld [vmem:[#allocation3 + $0x3c0] ss:$16 sps:$4 sm:$0xff]   ;;  %v5490_v6 = vld [vmem:[#allocation3 + $0xa8] ss:$16 sps:$4 sm:$0xff]  }
 0x389   :  { %3685 = vmatprep.subr.bf16.mxu1 %v5414_v8  ;;  %v5442_v34 = vld [vmem:[#allocation3 + $0x1a4] ss:$16 sps:$4 sm:$0xff]   ;;  %v5446_v36 = vld [vmem:[#allocation3 + $0x1a0] ss:$16 sps:$4 sm:$0xff]   ;;  %v5493_v7 = vld [vmem:[#allocation3 + $0x2a8] ss:$16 sps:$4 sm:$0xff]  }
 0x38a   :  { %v5444_v35 = vld [vmem:[#allocation3 + $0x3a4] ss:$16 sps:$4 sm:$0xff]   ;;  %v5447_v37 = vld [vmem:[#allocation3 + $0x3a0] ss:$16 sps:$4 sm:$0xff]   ;;  %v5498_v8 = vld [vmem:[#allocation3 + $0x8c] ss:$16 sps:$4 sm:$0xff]  }
 0x38b   :  { %3645 = vmatpush1.bf16.msra.mxu0 %v5416_v9  ;;  %v5448_v38 = vld [vmem:[#allocation3 + $0x184] ss:$16 sps:$4 sm:$0xff]   ;;  %v5452_v13 = vld [vmem:[#allocation3 + $0x180] ss:$16 sps:$4 sm:$0xff]   ;;  %v5501_v9 = vld [vmem:[#allocation3 + $0x28c] ss:$16 sps:$4 sm:$0xff]  }
 0x38c   :  { %3686 = vmatpush1.bf16.msra.mxu1 %v5417_v10  ;;  %3646 = vmatprep.subr.bf16.mxu0 %v5418_v12  ;;  %v5450_v39 = vld [vmem:[#allocation3 + $0x384] ss:$16 sps:$4 sm:$0xff]   ;;  %v5453_v47 = vld [vmem:[#allocation3 + $0x380] ss:$16 sps:$4 sm:$0xff]   ;;  %v5496_v10 = vld [vmem:[#allocation3 + $0x88] ss:$16 sps:$4 sm:$0xff]  }
 0x38d   :  { %3687 = vmatprep.subr.bf16.mxu1 %v5420_v42  ;;  %v5454_v48 = vld [vmem:[#allocation3 + $0x164] ss:$16 sps:$4 sm:$0xff]   ;;  %v5458_v57 = vld [vmem:[#allocation3 + $0x160] ss:$16 sps:$4 sm:$0xff]   ;;  %v5499_v12 = vld [vmem:[#allocation3 + $0x288] ss:$16 sps:$4 sm:$0xff]  }
 0x38e   :  { %v5456_v20 = vld [vmem:[#allocation3 + $0x364] ss:$16 sps:$4 sm:$0xff]   ;;  %v5459_v14 = vld [vmem:[#allocation3 + $0x360] ss:$16 sps:$4 sm:$0xff]   ;;  %v5504_v42 = vld [vmem:[#allocation3 + $0x6c] ss:$16 sps:$4 sm:$0xff]  }
 0x38f   :  { %3647 = vmatpush1.bf16.msra.mxu0 %v5422_v45  ;;  %v5460_v3 = vld [vmem:[#allocation3 + $0x144] ss:$16 sps:$4 sm:$0xff]   ;;  %v5464_v50 = vld [vmem:[#allocation3 + $0x140] ss:$16 sps:$4 sm:$0xff]   ;;  %v5507_v45 = vld [vmem:[#allocation3 + $0x26c] ss:$16 sps:$4 sm:$0xff]  }
 0x390   :  { %3688 = vmatpush1.bf16.msra.mxu1 %v5423_v15  ;;  %3648 = vmatprep.subr.bf16.mxu0 %v5424_v16  ;;  %v5462_v49 = vld [vmem:[#allocation3 + $0x344] ss:$16 sps:$4 sm:$0xff]   ;;  %v5465_v22 = vld [vmem:[#allocation3 + $0x340] ss:$16 sps:$4 sm:$0xff]   ;;  %v5502_v15 = vld [vmem:[#allocation3 + $0x68] ss:$16 sps:$4 sm:$0xff]  }
 0x391   :  { %3689 = vmatprep.subr.bf16.mxu1 %v5426_v17  ;;  %v5466_v1 = vld [vmem:[#allocation3 + $0x124] ss:$16 sps:$4 sm:$0xff]   ;;  %v5470_v19 = vld [vmem:[#allocation3 + $0x120] ss:$16 sps:$4 sm:$0xff]   ;;  %v5513_v16 = vld [vmem:[#allocation3 + $0x24c] ss:$16 sps:$4 sm:$0xff]  }
 0x392   :  { %v5468_v51 = vld [vmem:[#allocation3 + $0x324] ss:$16 sps:$4 sm:$0xff]   ;;  %v5471_v29 = vld [vmem:[#allocation3 + $0x320] ss:$16 sps:$4 sm:$0xff]   ;;  %v5508_v17 = vld [vmem:[#allocation3 + $0x48] ss:$16 sps:$4 sm:$0xff]  }
 0x393   :  { %3649 = vmatpush1.bf16.msra.mxu0 %v5428_v62  ;;  %v5472_v52 = vld [vmem:[#allocation3 + $0x104] ss:$16 sps:$4 sm:$0xff]   ;;  %v5476_v54 = vld [vmem:[#allocation3 + $0x100] ss:$16 sps:$4 sm:$0xff]   ;;  %v5511_v62 = vld [vmem:[#allocation3 + $0x248] ss:$16 sps:$4 sm:$0xff]  }
 0x394   :  { %3690 = vmatpush1.bf16.msra.mxu1 %v5429_v18  ;;  %3650 = vmatprep.subr.bf16.mxu0 %v5430_v21  ;;  %v5474_v53 = vld [vmem:[#allocation3 + $0x304] ss:$16 sps:$4 sm:$0xff]   ;;  %v5477_v32 = vld [vmem:[#allocation3 + $0x300] ss:$16 sps:$4 sm:$0xff]   ;;  %v5516_v18 = vld [vmem:[#allocation3 + $0x2c] ss:$16 sps:$4 sm:$0xff]  }
 0x395   :  { %3691 = vmatprep.subr.bf16.mxu1 %v5432_v23  ;;  %v5519_v21 = vld [vmem:[#allocation3 + $0x22c] ss:$16 sps:$4 sm:$0xff]   ;;  %v5514_v23 = vld [vmem:[#allocation3 + $0x28] ss:$16 sps:$4 sm:$0xff]  }
 0x397   :  { %3651 = vmatpush2.bf16.msra.mxu0 %v5434_v24  ;;  %v5517_v24 = vld [vmem:[#allocation3 + $0x228] ss:$16 sps:$4 sm:$0xff]  }
 0x398   :  { %3692 = vmatpush2.bf16.msra.mxu1 %v5435_v25  ;;  %3652 = vmatprep.subr.bf16.mxu0 %v5436_v27  ;;  %v5522_v25 = vld [vmem:[#allocation3 + $0xc] ss:$16 sps:$4 sm:$0xff]  }
 0x399   :  { %3693 = vmatprep.subr.bf16.mxu1 %v5438_v28  ;;  %v5525_v27 = vld [vmem:[#allocation3 + $0x20c] ss:$16 sps:$4 sm:$0xff]   ;;  %v5520_v28 = vld [vmem:[#allocation3 + $0x8] ss:$16 sps:$4 sm:$0xff]  }
 0x39b   :  { %3653 = vmatpush2.bf16.msra.mxu0 %v5440_v30  ;;  %v5523_v30 = vld [vmem:[#allocation3 + $0x208] ss:$16 sps:$4 sm:$0xff]  }
 0x39c   :  { %3694 = vmatpush2.bf16.msra.mxu1 %v5441_v33  ;;  %3654 = vmatprep.subr.bf16.mxu0 %v5442_v34  ;;  %v5528_v33 = vld [vmem:[#allocation3 + $0x1ec] ss:$16 sps:$4 sm:$0xff]  }
 0x39d   :  { %3695 = vmatprep.subr.bf16.mxu1 %v5444_v35  ;;  %v5531_v34 = vld [vmem:[#allocation3 + $0x3ec] ss:$16 sps:$4 sm:$0xff]   ;;  %v5526_v35 = vld [vmem:[#allocation3 + $0x1e8] ss:$16 sps:$4 sm:$0xff]  }
 0x39f   :  { %3655 = vmatpush2.bf16.msra.mxu0 %v5446_v36  ;;  %v5529_v36 = vld [vmem:[#allocation3 + $0x3e8] ss:$16 sps:$4 sm:$0xff]  }
 0x3a0   :  { %3696 = vmatpush2.bf16.msra.mxu1 %v5447_v37  ;;  %3656 = vmatprep.subr.bf16.mxu0 %v5448_v38  ;;  %v5534_v37 = vld [vmem:[#allocation3 + $0x1cc] ss:$16 sps:$4 sm:$0xff]  }
 0x3a1   :  { %3697 = vmatprep.subr.bf16.mxu1 %v5450_v39  ;;  %v5537_v38 = vld [vmem:[#allocation3 + $0x3cc] ss:$16 sps:$4 sm:$0xff]   ;;  %v5532_v39 = vld [vmem:[#allocation3 + $0x1c8] ss:$16 sps:$4 sm:$0xff]  }
 0x3a3   :  { %3657 = vmatpush2.bf16.msra.mxu0 %v5452_v13  ;;  %v5535_v13 = vld [vmem:[#allocation3 + $0x3c8] ss:$16 sps:$4 sm:$0xff]  }
 0x3a4   :  { %3698 = vmatpush2.bf16.msra.mxu1 %v5453_v47  ;;  %3658 = vmatprep.subr.bf16.mxu0 %v5454_v48  ;;  %v5540_v47 = vld [vmem:[#allocation3 + $0x1ac] ss:$16 sps:$4 sm:$0xff]  }
 0x3a5   :  { %3699 = vmatprep.subr.bf16.mxu1 %v5456_v20  ;;  %v5543_v48 = vld [vmem:[#allocation3 + $0x3ac] ss:$16 sps:$4 sm:$0xff]   ;;  %v5538_v20 = vld [vmem:[#allocation3 + $0x1a8] ss:$16 sps:$4 sm:$0xff]  }
 0x3a7   :  { %3659 = vmatpush2.bf16.msra.mxu0 %v5458_v57  ;;  %v5541_v57 = vld [vmem:[#allocation3 + $0x3a8] ss:$16 sps:$4 sm:$0xff]  }
 0x3a8   :  { %3700 = vmatpush2.bf16.msra.mxu1 %v5459_v14  ;;  %3660 = vmatprep.subr.bf16.mxu0 %v5460_v3  ;;  %v5546_v14 = vld [vmem:[#allocation3 + $0x18c] ss:$16 sps:$4 sm:$0xff]  }
 0x3a9   :  { %3701 = vmatprep.subr.bf16.mxu1 %v5462_v49  ;;  %v5549_v3 = vld [vmem:[#allocation3 + $0x38c] ss:$16 sps:$4 sm:$0xff]   ;;  %v5544_v49 = vld [vmem:[#allocation3 + $0x188] ss:$16 sps:$4 sm:$0xff]  }
 0x3ab   :  { %3661 = vmatpush2.bf16.msra.mxu0 %v5464_v50  ;;  %v5547_v50 = vld [vmem:[#allocation3 + $0x388] ss:$16 sps:$4 sm:$0xff]  }
 0x3ac   :  { %3702 = vmatpush2.bf16.msra.mxu1 %v5465_v22  ;;  %3662 = vmatprep.subr.bf16.mxu0 %v5466_v1  ;;  %v5552_v22 = vld [vmem:[#allocation3 + $0x16c] ss:$16 sps:$4 sm:$0xff]  }
 0x3ad   :  { %3703 = vmatprep.subr.bf16.mxu1 %v5468_v51  ;;  %v5555_v1 = vld [vmem:[#allocation3 + $0x36c] ss:$16 sps:$4 sm:$0xff]   ;;  %v5550_v51 = vld [vmem:[#allocation3 + $0x168] ss:$16 sps:$4 sm:$0xff]  }
 0x3af   :  { %3663 = vmatpush2.bf16.msra.mxu0 %v5470_v19  ;;  %v5553_v19 = vld [vmem:[#allocation3 + $0x368] ss:$16 sps:$4 sm:$0xff]  }
 0x3b0   :  { %3704 = vmatpush2.bf16.msra.mxu1 %v5471_v29  ;;  %3664 = vmatprep.subr.bf16.mxu0 %v5472_v52  ;;  %v5558_v29 = vld [vmem:[#allocation3 + $0x14c] ss:$16 sps:$4 sm:$0xff]  }
 0x3b1   :  { %3705 = vmatprep.subr.bf16.mxu1 %v5474_v53  ;;  %v5561_v52 = vld [vmem:[#allocation3 + $0x34c] ss:$16 sps:$4 sm:$0xff]   ;;  %v5556_v53 = vld [vmem:[#allocation3 + $0x148] ss:$16 sps:$4 sm:$0xff]  }
 0x3b3   :  { %3665 = vmatpush2.bf16.msra.mxu0 %v5476_v54  ;;  %v5559_v54 = vld [vmem:[#allocation3 + $0x348] ss:$16 sps:$4 sm:$0xff]  }
 0x3b4   :  { %3706 = vmatpush2.bf16.msra.mxu1 %v5477_v32  ;;  %3716 = vmatprep.subr.bf16.mxu0 %v5480_v31  ;;  %v5564_v32 = vld [vmem:[#allocation3 + $0x12c] ss:$16 sps:$4 sm:$0xff]  }
 0x3b5   :  { %3757 = vmatprep.subr.bf16.mxu1 %v5483_v26  ;;  %v5567_v31 = vld [vmem:[#allocation3 + $0x32c] ss:$16 sps:$4 sm:$0xff]   ;;  %v5562_v26 = vld [vmem:[#allocation3 + $0x128] ss:$16 sps:$4 sm:$0xff]  }
 0x3b6   :  { %3667 = vmatmul.mubr.bf16.vlgmr.msra.gmra.mxu0 %v5963_v40 }
 0x3b7   :  { %3708 = vmatmul.mubr.bf16.vlgmr.msra.gmra.mxu1 %v5981_v55  ;;  %3717 = vmatpush1.bf16.msra.mxu0 %v5478_v59  ;;  %v5565_v59 = vld [vmem:[#allocation3 + $0x328] ss:$16 sps:$4 sm:$0xff]  }
 0x3b8   :  { %3758 = vmatpush1.bf16.msra.mxu1 %v5481_v60  ;;  %3718 = vmatprep.subr.bf16.mxu0 %v5486_v61  ;;  %v5570_v60 = vld [vmem:[#allocation3 + $0x10c] ss:$16 sps:$4 sm:$0xff]  }
 0x3b9   :  { %3759 = vmatprep.subr.bf16.mxu1 %v5489_v63  ;;  %3748 = vmatprep.mubr.bf16.mxu0 %v5966_v41  ;;  %v5505_v41 = vld [vmem:[#allocation3 + $0x268] ss:$16 sps:$4 sm:$0xff]   ;;  %v5573_v61 = vld [vmem:[#allocation3 + $0x30c] ss:$16 sps:$4 sm:$0xff]  }
 0x3ba   :  { %3789 = vmatprep.mubr.bf16.mxu1 %v5984_v11  ;;  %v5510_v11 = vld [vmem:[#allocation3 + $0x4c] ss:$16 sps:$4 sm:$0xff]   ;;  %v5568_v63 = vld [vmem:[#allocation3 + $0x108] ss:$16 sps:$4 sm:$0xff]  }
 0x3bb   :  { %3719 = vmatpush1.bf16.msra.mxu0 %v5484_v0  ;;  %v5571_v0 = vld [vmem:[#allocation3 + $0x308] ss:$16 sps:$4 sm:$0xff]  }
 0x3bc   :  { %3760 = vmatpush1.bf16.msra.mxu1 %v5487_v2  ;;  %3720 = vmatprep.subr.bf16.mxu0 %v5492_v4 }
 0x3bd   :  { %3761 = vmatprep.subr.bf16.mxu1 %v5495_v5 }
 0x3bf   :  { %3721 = vmatpush1.bf16.msra.mxu0 %v5490_v6 }
 0x3c0   :  { %3762 = vmatpush1.bf16.msra.mxu1 %v5493_v7  ;;  %3722 = vmatprep.subr.bf16.mxu0 %v5498_v8 }
 0x3c1   :  { %3763 = vmatprep.subr.bf16.mxu1 %v5501_v9 }
 0x3c3   :  { %3723 = vmatpush1.bf16.msra.mxu0 %v5496_v10 }
 0x3c4   :  { %3764 = vmatpush1.bf16.msra.mxu1 %v5499_v12  ;;  %3724 = vmatprep.subr.bf16.mxu0 %v5504_v42 }
 0x3c5   :  { %3765 = vmatprep.subr.bf16.mxu1 %v5507_v45 }
 0x3c7   :  { %3725 = vmatpush1.bf16.msra.mxu0 %v5502_v15 }
 0x3c8   :  { %3766 = vmatpush1.bf16.msra.mxu1 %v5505_v41  ;;  %3726 = vmatprep.subr.bf16.mxu0 %v5510_v11 }
 0x3c9   :  { %3767 = vmatprep.subr.bf16.mxu1 %v5513_v16 }
 0x3cb   :  { %3727 = vmatpush1.bf16.msra.mxu0 %v5508_v17 }
 0x3cc   :  { %3768 = vmatpush1.bf16.msra.mxu1 %v5511_v62  ;;  %3728 = vmatprep.subr.bf16.mxu0 %v5516_v18 }
 0x3cd   :  { %3769 = vmatprep.subr.bf16.mxu1 %v5519_v21 }
 0x3cf   :  { %3729 = vmatpush1.bf16.msra.mxu0 %v5514_v23 }
 0x3d0   :  { %3770 = vmatpush1.bf16.msra.mxu1 %v5517_v24  ;;  %3730 = vmatprep.subr.bf16.mxu0 %v5522_v25 }
 0x3d1   :  { %3771 = vmatprep.subr.bf16.mxu1 %v5525_v27 }
 0x3d3   :  { %3731 = vmatpush1.bf16.msra.mxu0 %v5520_v28 }
 0x3d4   :  { %3772 = vmatpush1.bf16.msra.mxu1 %v5523_v30  ;;  %3732 = vmatprep.subr.bf16.mxu0 %v5528_v33 }
 0x3d5   :  { %3773 = vmatprep.subr.bf16.mxu1 %v5531_v34 }
 0x3d7   :  { %3733 = vmatpush2.bf16.msra.mxu0 %v5526_v35 }
 0x3d8   :  { %3774 = vmatpush2.bf16.msra.mxu1 %v5529_v36  ;;  %3734 = vmatprep.subr.bf16.mxu0 %v5534_v37 }
 0x3d9   :  { %3775 = vmatprep.subr.bf16.mxu1 %v5537_v38 }
 0x3db   :  { %3735 = vmatpush2.bf16.msra.mxu0 %v5532_v39 }
 0x3dc   :  { %3776 = vmatpush2.bf16.msra.mxu1 %v5535_v13  ;;  %3736 = vmatprep.subr.bf16.mxu0 %v5540_v47 }
 0x3dd   :  { %3777 = vmatprep.subr.bf16.mxu1 %v5543_v48 }
 0x3df   :  { %3737 = vmatpush2.bf16.msra.mxu0 %v5538_v20 }
 0x3e0   :  { %3778 = vmatpush2.bf16.msra.mxu1 %v5541_v57  ;;  %3738 = vmatprep.subr.bf16.mxu0 %v5546_v14 }
 0x3e1   :  { %3779 = vmatprep.subr.bf16.mxu1 %v5549_v3 }
 0x3e3   :  { %3739 = vmatpush2.bf16.msra.mxu0 %v5544_v49 }
 0x3e4   :  { %3780 = vmatpush2.bf16.msra.mxu1 %v5547_v50  ;;  %3740 = vmatprep.subr.bf16.mxu0 %v5552_v22 }
 0x3e5   :  { %3781 = vmatprep.subr.bf16.mxu1 %v5555_v1 }
 0x3e7   :  { %3741 = vmatpush2.bf16.msra.mxu0 %v5550_v51 }
 0x3e8   :  { %3782 = vmatpush2.bf16.msra.mxu1 %v5553_v19  ;;  %3742 = vmatprep.subr.bf16.mxu0 %v5558_v29 }
 0x3e9   :  { %3783 = vmatprep.subr.bf16.mxu1 %v5561_v52  ;;  %v5999_v52 = vsub.s32 4, %v5824_v43 }
 0x3eb   :  { %3743 = vmatpush2.bf16.msra.mxu0 %v5556_v53  ;;  %v6002_v53 = vsub.s32 5, %v5824_v43 }
 0x3ec   :  { %3784 = vmatpush2.bf16.msra.mxu1 %v5559_v54  ;;  %3744 = vmatprep.subr.bf16.mxu0 %v5564_v32  ;;  %v3885_v54 = vrot.slane %v5891_v44, %v5999_v52 }
 0x3ed   :  { %3785 = vmatprep.subr.bf16.mxu1 %v5567_v31 }
 0x3ef   :  { %3745 = vmatpush2.bf16.msra.mxu0 %v5562_v26  ;;  %v3905_v26 = vrot.slane %v5891_v44, %v6002_v53 }
 0x3f0   :  { %3786 = vmatpush2.bf16.msra.mxu1 %v5565_v59  ;;  %3746 = vmatprep.subr.bf16.mxu0 %v5570_v60  ;;  %v3889_v59 = vrot.slane %v5896_v46, %v5999_v52 }
 0x3f1   :  { %3787 = vmatprep.subr.bf16.mxu1 %v5573_v61 }
 0x3f3   :  { %3747 = vmatpush2.bf16.msra.mxu0 %v5568_v63 }
 0x3f4   :  { %3788 = vmatpush2.bf16.msra.mxu1 %v5571_v0  ;;  %v3909_v0 = vrot.slane %v5896_v46, %v6002_v53 }
 0x3f6   :  { %3749 = vmatmul.mubr.bf16.vlgmr.msra.gmra.mxu0 %v5963_v40 }
 0x3f7   :  { %3790 = vmatmul.mubr.bf16.vlgmr.msra.gmra.mxu1 %v5981_v55 }
 0x476   :  { %v3668_v2 = vpop.f32.mrf.mxu0 }
 0x477   :  { %v3709_v4 = vpop.f32.mrf.mxu1 }
 0x478   :  { %v3710_v5 = vadd.f32 %v3709_v4, %v3668_v2  ;;  %v3670_v6 = vpop.f32.mrf.mxu0 }
 0x479   :  { %v3711_v7 = vpop.f32.mrf.mxu1 }
 0x47a   :  { %v3798_v8 = vsel %vm1654_vm1, %v3710_v5, 0.0  ;;  %v3712_v9 = vadd.f32 %v3711_v7, %v3670_v6  ;;  %v3672_v12 = vpop.f32.mrf.mxu0 }
 0x47b   :  { %v3799_v10 = vrot.slane %v3798_v8, 4  ;;  %v3713_v42 = vpop.f32.mrf.mxu1 }
 0x47c   :  { %v3805_v45 = vsel %vm1654_vm1, %v3712_v9, 0.0  ;;  %v3673_v11 = vpop.f32.mrf.mxu0 }
 0x47d   :  { %v3800_v15 = vadd.f32 %v3799_v10, %v3798_v8  ;;  %v3806_v41 = vrot.slane %v3805_v45, 4  ;;  %v3714_v16 = vpop.f32.mrf.mxu1 }
 0x47f   :  { %v3801_v40 = vrot.slane %v3800_v15, 2  ;;  %v3807_v17 = vadd.f32 %v3806_v41, %v3805_v45 }
 0x481   :  { %v3802_v55 = vadd.f32 %v3801_v40, %v3800_v15  ;;  %v3808_v62 = vrot.slane %v3807_v17, 2 }
 0x483   :  { %v3803_v18 = vrot.slane %v3802_v55, 1  ;;  %v3809_v21 = vadd.f32 %v3808_v62, %v3807_v17 }
 0x485   :  { %v3804_v23 = vadd.f32 %v3803_v18, %v3802_v55  ;;  %v3810_v24 = vrot.slane %v3809_v21, 1 }
 0x487   :  { %v3826_v25 = vmul.f32 0.5, %v3804_v23  ;;  %v3811_v27 = vadd.f32 %v3810_v24, %v3809_v21 }
 0x489   :  { %v3830_v28 = vsub.f32 %v3710_v5, %v3826_v25  ;;  %v3827_v30 = vmul.f32 0.5, %v3811_v27 }
 0x48b   :  { %v3834_v33 = vmul.f32 %v3830_v28, %v3830_v28  ;;  %v3831_v34 = vsub.f32 %v3712_v9, %v3827_v30 }
 0x48d   :  { %v3838_v35 = vsel %vm1654_vm1, %v3834_v33, 0.0  ;;  %v3835_v36 = vmul.f32 %v3831_v34, %v3831_v34 }
 0x48e   :  { %v3839_v37 = vrot.slane %v3838_v35, 4 }
 0x48f   :  { %v3845_v38 = vsel %vm1654_vm1, %v3835_v36, 0.0 }
 0x490   :  { %v3840_v39 = vadd.f32 %v3839_v37, %v3838_v35  ;;  %v3846_v13 = vrot.slane %v3845_v38, 4 }
 0x492   :  { %v3841_v47 = vrot.slane %v3840_v39, 2  ;;  %v3847_v48 = vadd.f32 %v3846_v13, %v3845_v38 }
 0x494   :  { %v3842_v20 = vadd.f32 %v3841_v47, %v3840_v39  ;;  %v3848_v57 = vrot.slane %v3847_v48, 2 }
 0x496   :  { %v3843_v14 = vrot.slane %v3842_v20, 1  ;;  %v3849_v3 = vadd.f32 %v3848_v57, %v3847_v48 }
 0x498   :  { %v3844_v49 = vadd.f32 %v3843_v14, %v3842_v20  ;;  %v3850_v50 = vrot.slane %v3849_v3, 1 }
 0x49a   :  { %v3866_v22 = vmul.f32 0.5, %v3844_v49  ;;  %v3851_v1 = vadd.f32 %v3850_v50, %v3849_v3 }
 0x49c   :  { %v3870_v51 = vadd.f32 1e-05, %v3866_v22  ;;  %v3867_v19 = vmul.f32 0.5, %v3851_v1 }
 0x49e   :  { %5574 = vrsqrt.f32 %v3870_v51  ;;  %v3871_v29 = vadd.f32 1e-05, %v3867_v19 }
 0x4a0   :  { %5576 = vrsqrt.f32 %v3871_v29 }
 0x4ab   :  { %v5575_v32 = vpop.eup %5574 }
 0x4ac   :  { %v3878_v31 = vmul.f32 %v5575_v32, %v3830_v28 }
 0x4ad   :  { %v5577_v60 = vpop.eup %5576 }
 0x4ae   :  { %v3898_v61 = vmul.f32 %v3885_v54, %v3878_v31  ;;  %v3879_v63 = vmul.f32 %v5577_v60, %v3831_v34 }
 0x4b0   :  { %v6012_v2 = vadd.f32 %v3905_v26, %v3898_v61  ;;  %v3899_v4 = vmul.f32 %v3889_v59, %v3879_v63  ;;  %v3893_v59 = vrot.slane %v5918_v56, %v5999_v52  ;;  %v3913_v63 = vrot.slane %v5918_v56, %v6002_v53 }
 0x4b2   :  { %v3922_v5 = vpack.c.bf16 %v6012_v2, %v6012_v2  ;;  %v6016_v6 = vadd.f32 %v3909_v0, %v3899_v4  ;;  %v3897_v0 = vrot.slane %v5920_v58, %v5999_v52 }
 0x4b4   :  { %v3923_v7 = vpack.c.bf16 %v6016_v6, %v6016_v6 }
 0x4b6   :  { %v3750_v8 = vpop.f32.mrf.mxu0 }
 0x4b7   :  { %v3791_v9 = vpop.f32.mrf.mxu1 }
 0x4b8   :  { %v3792_v10 = vadd.f32 %v3791_v9, %v3750_v8  ;;  %v3752_v12 = vpop.f32.mrf.mxu0 }
 0x4b9   :  { %v3793_v42 = vpop.f32.mrf.mxu1 }
 0x4ba   :  { %v3812_v45 = vsel %vm1654_vm1, %v3792_v10, 0.0  ;;  %v3794_v15 = vadd.f32 %v3793_v42, %v3752_v12  ;;  %v3754_v41 = vpop.f32.mrf.mxu0 }
 0x4bb   :  { %v3813_v46 = vrot.slane %v3812_v45, 4  ;;  %v3795_v11 = vpop.f32.mrf.mxu1 }
 0x4bc   :  { %v3819_v16 = vsel %vm1654_vm1, %v3794_v15, 0.0  ;;  %v3755_v55 = vpop.f32.mrf.mxu0 }
 0x4bd   :  { %v3814_v40 = vadd.f32 %v3813_v46, %v3812_v45  ;;  %v3820_v17 = vrot.slane %v3819_v16, 4  ;;  %v3796_v62 = vpop.f32.mrf.mxu1 }
 0x4bf   :  { %v3815_v18 = vrot.slane %v3814_v40, 2  ;;  %v3821_v21 = vadd.f32 %v3820_v17, %v3819_v16 }
 0x4c1   :  { %v3816_v23 = vadd.f32 %v3815_v18, %v3814_v40  ;;  %v3822_v24 = vrot.slane %v3821_v21, 2 }
 0x4c3   :  { %v3817_v25 = vrot.slane %v3816_v23, 1  ;;  %v3823_v27 = vadd.f32 %v3822_v24, %v3821_v21 }
 0x4c5   :  { %v3818_v28 = vadd.f32 %v3817_v25, %v3816_v23  ;;  %v3824_v30 = vrot.slane %v3823_v27, 1 }
 0x4c7   :  { %v3828_v33 = vmul.f32 0.5, %v3818_v28  ;;  %v3825_v34 = vadd.f32 %v3824_v30, %v3823_v27 }
 0x4c9   :  { %v3832_v35 = vsub.f32 %v3792_v10, %v3828_v33  ;;  %v3829_v36 = vmul.f32 0.5, %v3825_v34  ;;  %v3917_v10 = vrot.slane %v5920_v58, %v6002_v53 }
 0x4cb   :  { %v3836_v37 = vmul.f32 %v3832_v35, %v3832_v35  ;;  %v3833_v38 = vsub.f32 %v3794_v15, %v3829_v36 }
 0x4cd   :  { %v3852_v39 = vsel %vm1654_vm1, %v3836_v37, 0.0  ;;  %v3837_v13 = vmul.f32 %v3833_v38, %v3833_v38 }
 0x4ce   :  { %v3853_v47 = vrot.slane %v3852_v39, 4 }
 0x4cf   :  { %v3859_v48 = vsel %vm1654_vm1, %v3837_v13, 0.0 }
 0x4d0   :  { %v3854_v20 = vadd.f32 %v3853_v47, %v3852_v39  ;;  %v3860_v57 = vrot.slane %v3859_v48, 4 }
 0x4d2   :  { %v3855_v14 = vrot.slane %v3854_v20, 2  ;;  %v3861_v3 = vadd.f32 %v3860_v57, %v3859_v48 }
 0x4d4   :  { %v3856_v49 = vadd.f32 %v3855_v14, %v3854_v20  ;;  %v3862_v50 = vrot.slane %v3861_v3, 2 }
 0x4d6   :  { %v3857_v22 = vrot.slane %v3856_v49, 1  ;;  %v3863_v1 = vadd.f32 %v3862_v50, %v3861_v3 }
 0x4d8   :  { %v3858_v51 = vadd.f32 %v3857_v22, %v3856_v49  ;;  %v3864_v19 = vrot.slane %v3863_v1, 1 }
 0x4da   :  { %v3868_v29 = vmul.f32 0.5, %v3858_v51  ;;  %v3865_v54 = vadd.f32 %v3864_v19, %v3863_v1 }
 0x4dc   :  { %v3872_v32 = vadd.f32 1e-05, %v3868_v29  ;;  %v3869_v31 = vmul.f32 0.5, %v3865_v54 }
 0x4de   :  { %5578 = vrsqrt.f32 %v3872_v32  ;;  %v3873_v26 = vadd.f32 1e-05, %v3869_v31 }
 0x4e0   :  { %5580 = vrsqrt.f32 %v3873_v26 }
 0x4eb   :  { %v5579_v60 = vpop.eup %5578 }
 0x4ec   :  { %v3880_v61 = vmul.f32 %v5579_v60, %v3832_v35 }
 0x4ed   :  { %v5581_v4 = vpop.eup %5580 }
 0x4ee   :  { %v3900_v8 = vmul.f32 %v3893_v59, %v3880_v61  ;;  %v3881_v9 = vmul.f32 %v5581_v4, %v3833_v38 }
 0x4f0   :  { %v6032_v12 = vadd.f32 %v3913_v63, %v3900_v8  ;;  %v3901_v42 = vmul.f32 %v3897_v0, %v3881_v9 }
 0x4f2   :  { %v3924_v45 = vpack.c.bf16 %v6032_v12, %v6032_v12  ;;  %v3921_v15 = vadd.f32 %v3917_v10, %v3901_v42 }
 0x4f4   :  { %v3925_v46 = vpack.c.bf16 %v3921_v15, %v3921_v15 }
 0x4f5   :  { %5764 = dma.done.wait [#allocation5 + $0x2], 4096 }
 0x4f6   :  { %5765 = vsyncadd [#allocation5 + $0x2], 4294963200  ;;  %4217 = vmatprep.mubr.bf16.mxu0 %v3923_v7  ;;  %4257 = vmatprep.mubr.bf16.mxu1 %v3925_v46  ;;  %v5582_v56 = vld [vmem:[#allocation4 + $0x78] sm:$0xff]   ;;  %v5586_v53 = vld [vmem:[#allocation4 + $0x70] sm:$0xff]   ;;  %s5779_s3 = smov [#allocation12]  }
 0x4f7   :  { %v5583_v52 = vld [vmem:[#allocation4 + $0xf8] sm:$0xff]   ;;  %4822 = vmatprep.subr.bf16.mxu0 %v5582_v56  ;;  %v5587_v11 = vld [vmem:[#allocation4 + $0xf0] sm:$0xff]   ;;  %v5590_v17 = vld [vmem:[#allocation4 + $0x68] sm:$0xff]   ;;  %v4288_v56 = vsub.s32 6, %v5824_v43  ;;  %s4303_s4 = sshll.u32 %s5779_s3, 4  ;;  %s4304_s4 = int_to_ptr.vmem [resolvable:$true] %s4303_s4 }
 0x4f8   :  { %v5584_v41 = vld [vmem:[#allocation4 + $0x38] sm:$0xff]   ;;  %4844 = vmatprep.subr.bf16.mxu1 %v5583_v52  ;;  %v5588_v16 = vld [vmem:[#allocation4 + $0x30] sm:$0xff]   ;;  %v5591_v6 = vld [vmem:[#allocation4 + $0xe8] sm:$0xff]   ;;  %v4293_v52 = vsub.s32 7, %v5824_v43  ;;  %s5736_s25 = scalar_lea.vmem %s4304_s4, 32  ;;  %p5741_p3 = scmp.lt.s32.totalorder %s4304_s4, %s4304_s4 }
 0x4f9   :  { %v5585_v58 = vld [vmem:[#allocation4 + $0xb8] sm:$0xff]   ;;  %4823 = vmatpush3.bf16.msra.mxu0 %v5584_v41  ;;  %v5589_v40 = vld [vmem:[#allocation4 + $0xb0] sm:$0xff]   ;;  %v5592_v7 = vld [vmem:[#allocation4 + $0x28] sm:$0xff]   ;;  %v4289_v41 = vrot.slane %v5891_v44, %v4288_v56  ;;  %p5737_p2 = scmp.ne.s32.totalorder %s4304_s4, %s5736_s25  ;;  %p5742_p4 = scmp.lt.s32.totalorder %s5736_s25, %s5736_s25 }
 0x4fa   :  { %4845 = vmatpush3.bf16.msra.mxu1 %v5585_v58  ;;  %4824 = vmatprep.subr.bf16.mxu0 %v5586_v53  ;;  %v5593_v55 = vld [vmem:[#allocation4 + $0xa8] sm:$0xff]   ;;  %v5594_v62 = vld [vmem:[#allocation4 + $0x60] sm:$0xff]   ;;  %v5598_v24 = vld [vmem:[#allocation4 + $0x58] sm:$0xff]  }
 0x4fb   :  { %4846 = vmatprep.subr.bf16.mxu1 %v5587_v11  ;;  %v5595_v18 = vld [vmem:[#allocation4 + $0xe0] sm:$0xff]   ;;  %v5599_v25 = vld [vmem:[#allocation4 + $0xd8] sm:$0xff]   ;;  %v5602_v30 = vld [vmem:[#allocation4 + $0x50] sm:$0xff]   ;;  %v4294_v11 = vrot.slane %v5891_v44, %v4293_v52  ;;  %p5743_p5 = por %p5742_p4, %p5741_p3 }
 0x4fc   :  { %v5596_v21 = vld [vmem:[#allocation4 + $0x20] sm:$0xff]   ;;  %v5600_v27 = vld [vmem:[#allocation4 + $0x18] sm:$0xff]   ;;  %v5603_v33 = vld [vmem:[#allocation4 + $0xd0] sm:$0xff]  }
 0x4fd   :  { %4825 = vmatpush3.bf16.msra.mxu0 %v5588_v16  ;;  %v5597_v23 = vld [vmem:[#allocation4 + $0xa0] sm:$0xff]   ;;  %v5601_v28 = vld [vmem:[#allocation4 + $0x98] sm:$0xff]   ;;  %v5604_v34 = vld [vmem:[#allocation4 + $0x10] sm:$0xff]   ;;  %p5744_p6 = pnand %p5743_p5, %p5737_p2 }
 0x4fe   :  { %4847 = vmatpush3.bf16.msra.mxu1 %v5589_v40  ;;  %4826 = vmatprep.subr.bf16.mxu0 %v5590_v17  ;;  %v5605_v35 = vld [vmem:[#allocation4 + $0x90] sm:$0xff]   ;;  %v5606_v36 = vld [vmem:[#allocation4 + $0x48] sm:$0xff]   ;;  %v5610_v13 = vld [vmem:[#allocation4 + $0x40] sm:$0xff]  }
 0x4ff   :  { %4848 = vmatprep.subr.bf16.mxu1 %v5591_v6  ;;  %v5607_v37 = vld [vmem:[#allocation4 + $0xc8] sm:$0xff]   ;;  %v5611_v47 = vld [vmem:[#allocation4 + $0xc0] sm:$0xff]  }
 0x500   :  { %v5608_v38 = vld [vmem:[#allocation4 + $0x8] sm:$0xff]   ;;  %v5612_v48 = vld [vmem:[#allocation4] sm:$0xff]  }
 0x501   :  { %4827 = vmatpush3.bf16.msra.mxu0 %v5592_v7  ;;  %v5609_v39 = vld [vmem:[#allocation4 + $0x88] sm:$0xff]   ;;  %v5613_v20 = vld [vmem:[#allocation4 + $0x80] sm:$0xff]  }
 0x502   :  { %4849 = vmatpush3.bf16.msra.mxu1 %v5593_v55  ;;  %4828 = vmatprep.subr.bf16.mxu0 %v5594_v62 }
 0x503   :  { %4850 = vmatprep.subr.bf16.mxu1 %v5595_v18 }
 0x505   :  { %4829 = vmatpush3.bf16.msra.mxu0 %v5596_v21 }
 0x506   :  { %4851 = vmatpush3.bf16.msra.mxu1 %v5597_v23  ;;  %4830 = vmatprep.subr.bf16.mxu0 %v5598_v24 }
 0x507   :  { %4852 = vmatprep.subr.bf16.mxu1 %v5599_v25 }
 0x509   :  { %4831 = vmatpush3.bf16.msra.mxu0 %v5600_v27 }
 0x50a   :  { %4853 = vmatpush3.bf16.msra.mxu1 %v5601_v28  ;;  %4832 = vmatprep.subr.bf16.mxu0 %v5602_v30 }
 0x50b   :  { %4854 = vmatprep.subr.bf16.mxu1 %v5603_v33 }
 0x50d   :  { %4833 = vmatpush3.bf16.msra.mxu0 %v5604_v34 }
 0x50e   :  { %4855 = vmatpush3.bf16.msra.mxu1 %v5605_v35  ;;  %4834 = vmatprep.subr.bf16.mxu0 %v5606_v36 }
 0x50f   :  { %4856 = vmatprep.subr.bf16.mxu1 %v5607_v37 }
 0x511   :  { %4835 = vmatpush3.bf16.msra.mxu0 %v5608_v38 }
 0x512   :  { %4857 = vmatpush3.bf16.msra.mxu1 %v5609_v39  ;;  %4836 = vmatprep.subr.bf16.mxu0 %v5610_v13 }
 0x513   :  { %4858 = vmatprep.subr.bf16.mxu1 %v5611_v47 }
 0x515   :  { %4837 = vmatpush3.bf16.msra.mxu0 %v5612_v48 }
 0x516   :  { %4859 = vmatpush3.bf16.msra.mxu1 %v5613_v20 }
 0x518   :  { %4218 = vmatmul.mubr.bf16.vlgmr.msra.gmra.mxu0 %v3922_v5 }
 0x519   :  { %4258 = vmatmul.mubr.bf16.vlgmr.msra.gmra.mxu1 %v3924_v45 }
 0x5d8   :  { %v4838_v57 = vpop.f32.mrf.mxu0 }
 0x5d9   :  { %v4860_v14 = vpop.f32.mrf.mxu1 }
 0x5da   :  { %v4839_v3 = vpop.f32.mrf.mxu0 }
 0x5db   :  { %v4840_v49 = vadd.f32 %v4839_v3, %v4838_v57  ;;  %v4861_v50 = vpop.f32.mrf.mxu1 }
 0x5dc   :  { %v4862_v22 = vadd.f32 %v4861_v50, %v4860_v14  ;;  %v4841_v1 = vpop.f32.mrf.mxu0 }
 0x5dd   :  { %v4863_v51 = vpop.f32.mrf.mxu1 }
 0x5de   :  { %v4260_v19 = vadd.f32 %v4862_v22, %v4840_v49  ;;  %v4842_v29 = vpop.f32.mrf.mxu0 }
 0x5df   :  { %v4864_v54 = vpop.f32.mrf.mxu1 }
 0x5e0   :  { %v4265_v32 = vsel %vm1654_vm1, %v4260_v19, 0.0 }
 0x5e1   :  { %v4266_v31 = vrot.slane %v4265_v32, 4 }
 0x5e3   :  { %v4267_v2 = vadd.f32 %v4266_v31, %v4265_v32 }
 0x5e5   :  { %v4268_v5 = vrot.slane %v4267_v2, 2 }
 0x5e7   :  { %v4269_v26 = vadd.f32 %v4268_v5, %v4267_v2 }
 0x5e9   :  { %v4270_v59 = vrot.slane %v4269_v26, 1 }
 0x5eb   :  { %v4271_v60 = vadd.f32 %v4270_v59, %v4269_v26 }
 0x5ed   :  { %v4272_v61 = vmul.f32 0.5, %v4271_v60 }
 0x5ef   :  { %v4273_v63 = vsub.f32 %v4260_v19, %v4272_v61 }
 0x5f1   :  { %v4274_v0 = vmul.f32 %v4273_v63, %v4273_v63 }
 0x5f3   :  { %v4275_v4 = vsel %vm1654_vm1, %v4274_v0, 0.0 }
 0x5f4   :  { %v4276_v8 = vrot.slane %v4275_v4, 4 }
 0x5f6   :  { %v4277_v9 = vadd.f32 %v4276_v8, %v4275_v4 }
 0x5f8   :  { %v4278_v10 = vrot.slane %v4277_v9, 2 }
 0x5fa   :  { %v4279_v12 = vadd.f32 %v4278_v10, %v4277_v9 }
 0x5fc   :  { %v4280_v42 = vrot.slane %v4279_v12, 1 }
 0x5fe   :  { %v4281_v45 = vadd.f32 %v4280_v42, %v4279_v12 }
 0x600   :  { %v4282_v15 = vmul.f32 0.5, %v4281_v45 }
 0x602   :  { %v4283_v46 = vadd.f32 1e-05, %v4282_v15 }
 0x604   :  { %5614 = vrsqrt.f32 %v4283_v46 }
 0x611   :  { %v5615_v58 = vpop.eup %5614 }
 0x612   :  { %v4285_v53 = vmul.f32 %v5615_v58, %v4273_v63 }
 0x614   :  { %v4290_v16 = vmul.f32 %v4289_v41, %v4285_v53 }
 0x616   :  { %v4295_v40 = vadd.f32 %v4294_v11, %v4290_v16 }
 0x618   :  { %4296 = vst [vmem:[#allocation12] sm:$0x3] %v4295_v40 }
 0x619   :  { %5747 = shalt.err (!%p5744_p6)
}
 0x61a   :  { %4306 = dma.vmem_to_hbm [thread:$0]  %s4304_s4, 32, %s6060_s6, [#allocation8]  }
 0x61b   :  { %5766 = dma.done.wait [#allocation8], 32  }
 0x61c   :  { %5767 = vsyncadd [#allocation8], 4294967264 }
 0x61d   :  { %4310 = vsyncpa [#allocation7], 1 }
 0x61e   :  { %4311 = vsyncpa [#allocation10], 1 }
 0x61f   :  { %4312 = vsyncpa [#allocation8], 1 }
 0x620   :  { %4313 = vsyncmov [#allocation5] }
 0x623   :  { %s4314_s28 = vpop.sfrf %4313 }
 0x624   :  { %p4819_p7 = scmp.ne.s32.totalorder %s4314_s28, 0 }
 0x626   :  { %4318 = shalt.err (%p4819_p7)  }
 0x627   :  { %4320 = vsyncmov [#allocation5 + $0x1] }
 0x62a   :  { %s4321_s29 = vpop.sfrf %4320 }
 0x62b   :  { %p4820_p8 = scmp.ne.s32.totalorder %s4321_s29, 0 }
 0x62d   :  { %4325 = shalt.err (%p4820_p8)  }
 0x62e   :  { %4327 = vsyncmov [#allocation5 + $0x2] }
 0x631   :  { %s4328_s30 = vpop.sfrf %4327 }
 0x632   :  { %p4821_p9 = scmp.ne.s32.totalorder %s4328_s30, 0 }
 0x634   :  { %4332 = shalt.err (%p4821_p9)  }

</bundles_post_ra>
